<compile_context>
chip_gen: v7x
topology: tpu7x:2x2x1
jax: 0.10.0
libtpu: 0.0.40
codegen_flags: <defaults>
</compile_context>

<pallas_src>
import functools

import jax
import jax.numpy as jnp
from jax.experimental import pallas as pl
from jax.experimental.pallas import tpu as pltpu


def _round_up(x, m):
    return (x + m - 1) // m * m


# ---------------------------------------------------------------------------
# Kernel 1: batched input projection  gates_x = X @ W_ih_t + b   (one big matmul)
# ---------------------------------------------------------------------------
def _proj_kernel(x_ref, w_ref, b_ref, o_ref, acc_ref):
    k = pl.program_id(2)

    @pl.when(k == 0)
    def _():
        acc_ref[...] = jnp.zeros_like(acc_ref)

    acc_ref[...] += jnp.dot(x_ref[...], w_ref[...],
                            preferred_element_type=jnp.float32)

    @pl.when(k == pl.num_programs(2) - 1)
    def _():
        o_ref[...] = acc_ref[...] + b_ref[...]


def input_projection(x_2d, w_t, b):
    """x_2d: (M, K) = (T*Bp, In_p);  w_t: (K, N) = (In_p, 4Hp);  b: (1, N)."""
    M, K = x_2d.shape
    N = w_t.shape[1]
    tm = min(M, 256)                       # M is a multiple of 8 (Bp padded)
    tn = min(N, 512)                       # N = 4*Hp is a multiple of 512
    tk = 512 if K % 512 == 0 else (256 if K % 256 == 0 else 128)  # divides K
    tk = min(tk, K)
    grid = (pl.cdiv(M, tm), N // tn, K // tk)
    return pl.pallas_call(
        _proj_kernel,
        out_shape=jax.ShapeDtypeStruct((M, N), jnp.float32),
        grid_spec=pltpu.PrefetchScalarGridSpec(
            num_scalar_prefetch=0,
            grid=grid,
            in_specs=[
                pl.BlockSpec((tm, tk), lambda i, j, k: (i, k)),
                pl.BlockSpec((tk, tn), lambda i, j, k: (k, j)),
                pl.BlockSpec((1, tn), lambda i, j, k: (0, j)),
            ],
            out_specs=pl.BlockSpec((tm, tn), lambda i, j, k: (i, j)),
            scratch_shapes=[pltpu.VMEM((tm, tn), jnp.float32)],
        ),
        compiler_params=pltpu.CompilerParams(
            dimension_semantics=("parallel", "parallel", "arbitrary")),
    )(x_2d, w_t, b)


# ---------------------------------------------------------------------------
# Kernel 2: recurrence.  gates_x chunk (Tc, Bb, 4Hp) in VMEM; in-kernel time loop;
# h/c carried in VMEM scratch across time chunks.
# ---------------------------------------------------------------------------
def _lstm_recur_kernel(gx_ref, whh_ref, out_ref, h_scr, c_scr, *, tc):
    Hp = h_scr.shape[-1]

    @pl.when(pl.program_id(1) == 0)        # first time-chunk for this batch chunk
    def _():
        h_scr[...] = jnp.zeros_like(h_scr)
        c_scr[...] = jnp.zeros_like(c_scr)

    w_hh = whh_ref[...]                    # (Hp, 4Hp), resident

    def step(t, carry):
        h_prev = h_scr[...]
        c_prev = c_scr[...]
        gates = gx_ref[t] + jnp.dot(h_prev, w_hh,
                                    preferred_element_type=jnp.float32)
        i = jax.nn.sigmoid(gates[:, 0 * Hp:1 * Hp])
        f = jax.nn.sigmoid(gates[:, 1 * Hp:2 * Hp])
        g = jnp.tanh(gates[:, 2 * Hp:3 * Hp])
        o = jax.nn.sigmoid(gates[:, 3 * Hp:4 * Hp])
        c_new = f * c_prev + i * g
        h_new = o * jnp.tanh(c_new)
        c_scr[...] = c_new
        h_scr[...] = h_new
        out_ref[t] = h_new
        return carry

    jax.lax.fori_loop(0, tc, step, 0, unroll=True)


def lstm_recurrence(gates_x, w_hh_t):
    """gates_x: (T, Bp, 4Hp) with bias folded in;  w_hh_t: (Hp, 4Hp)."""
    T, Bp, N4 = gates_x.shape
    Hp = N4 // 4
    tc = min(T, 32)                                        # time chunk (unrolled loop)
    bb = Bp // 2 if (Bp % 16 == 0 and Bp >= 16) else Bp    # batch chunk (megacore/2-TC)
    nb = Bp // bb

    need = (2 * tc * bb * N4 * 4        # gates_x chunk, double-buffered
            + 2 * tc * bb * Hp * 4      # output chunk, double-buffered
            + 2 * Hp * N4 * 4           # w_hh (constant block, default buffering)
            + 2 * bb * Hp * 4)          # h/c scratch
    vmem_limit = min(64 * 1024 * 1024, max(32 * 1024 * 1024, int(need * 1.5)))

    kernel = functools.partial(_lstm_recur_kernel, tc=tc)
    return pl.pallas_call(
        kernel,
        out_shape=jax.ShapeDtypeStruct((T, Bp, Hp), jnp.float32),
        grid_spec=pltpu.PrefetchScalarGridSpec(
            num_scalar_prefetch=0,
            grid=(nb, pl.cdiv(T, tc)),
            in_specs=[
                pl.BlockSpec((tc, bb, N4), lambda b, t: (t, b, 0)),
                pl.BlockSpec((Hp, N4), lambda b, t: (0, 0)),
            ],
            out_specs=pl.BlockSpec((tc, bb, Hp), lambda b, t: (t, b, 0)),
            scratch_shapes=[pltpu.VMEM((bb, Hp), jnp.float32),
                            pltpu.VMEM((bb, Hp), jnp.float32)],
        ),
        compiler_params=pltpu.CompilerParams(
            dimension_semantics=("parallel", "arbitrary"),   # batch ∥, time sequential
            vmem_limit_bytes=vmem_limit),
    )(gates_x, w_hh_t)


# ---------------------------------------------------------------------------
# Parameters (PyTorch-default init) + lane/sublane-aligned padded copies
# ---------------------------------------------------------------------------
def _pad_gate_cols(w_t, H, Hp, in_dim, in_p):
    """(in_dim, 4H) -> (in_p, 4Hp): each gate's H columns placed at k*Hp; rest zero."""
    out = jnp.zeros((in_p, 4 * Hp), w_t.dtype)
    for g in range(4):
        out = out.at[:in_dim, g * Hp:g * Hp + H].set(w_t[:, g * H:(g + 1) * H])
    return out


def _pad_gate_bias(b, H, Hp):
    out = jnp.zeros((1, 4 * Hp), b.dtype)
    for g in range(4):
        out = out.at[0, g * Hp:g * Hp + H].set(b[g * H:(g + 1) * H])
    return out


def init_params(key, num_features, hidden_units, num_layers, output_size):
    H = hidden_units
    Hp = _round_up(H, 128)
    params = {"lstm": [], "linear": {}}
    k_lstm = 1.0 / jnp.sqrt(jnp.float32(H))
    in_size = num_features
    in_p = _round_up(num_features, 128)
    for _ in range(num_layers):
        key, k1, k2, k3, k4 = jax.random.split(key, 5)
        w_ih = jax.random.uniform(k1, (4 * H, in_size), jnp.float32, -k_lstm, k_lstm)
        w_hh = jax.random.uniform(k2, (4 * H, H), jnp.float32, -k_lstm, k_lstm)
        b_ih = jax.random.uniform(k3, (4 * H,), jnp.float32, -k_lstm, k_lstm)
        b_hh = jax.random.uniform(k4, (4 * H,), jnp.float32, -k_lstm, k_lstm)
        b = b_ih + b_hh
        w_ih_t = w_ih.T                          # (in_size, 4H)
        w_hh_t = w_hh.T                          # (H, 4H)
        params["lstm"].append({
            # unpadded (reference)
            "w_ih_t": w_ih_t,
            "w_hh_t": w_hh_t,
            "b": b.reshape(1, 4 * H),
            # padded (kernels)
            "w_ih_tp": _pad_gate_cols(w_ih_t, H, Hp, in_size, in_p),
            "w_hh_tp": _pad_gate_cols(w_hh_t, H, Hp, H, Hp),
            "b_p": _pad_gate_bias(b, H, Hp),
        })
        in_size = H
        in_p = Hp
    key, k1, k2 = jax.random.split(key, 3)
    k_lin = 1.0 / jnp.sqrt(jnp.float32(H))
    w = jax.random.uniform(k1, (output_size, H), jnp.float32, -k_lin, k_lin)
    b = jax.random.uniform(k2, (output_size,), jnp.float32, -k_lin, k_lin)
    params["linear"] = {"w_t": w.T, "b": b.reshape(1, output_size)}
    return params


# ---------------------------------------------------------------------------
# Forward:  lstm_out, _ = lstm(x);  y = linear(lstm_out[:, -1, :])
# ---------------------------------------------------------------------------
@jax.jit
def lstm_model_forward(x_btf, params):
    x = jnp.transpose(x_btf, (1, 0, 2)).astype(jnp.float32)   # (T, B, F)
    T, B, F = x.shape
    Bp = _round_up(B, 8)
    first_in_p = params["lstm"][0]["w_ih_tp"].shape[0]
    x = jnp.pad(x, ((0, 0), (0, Bp - B), (0, first_in_p - F)))  # (T, Bp, Fp)

    for layer in params["lstm"]:
        in_p = layer["w_ih_tp"].shape[0]
        n4 = layer["w_ih_tp"].shape[1]
        # 1) input projection for ALL timesteps: one MXU-shaped matmul (bias folded in).
        gx = input_projection(x.reshape(T * Bp, in_p), layer["w_ih_tp"], layer["b_p"])
        gx = gx.reshape(T, Bp, n4)
        # 2) sequential recurrence over precomputed gates.
        x = lstm_recurrence(gx, layer["w_hh_tp"])              # (T, Bp, Hp)
        # TODO(synk): inter-layer dropout (training mode only) intentionally omitted.

    H = params["linear"]["w_t"].shape[0]
    last = x[T - 1, :B, :H]                                    # (B, H)
    # Tiny head left to XLA (fuses; avoids a standalone masked-store kernel launch).
    return last @ params["linear"]["w_t"] + params["linear"]["b"]


# ---------------------------------------------------------------------------
# Pure-JAX reference (unpadded) for correctness check
# ---------------------------------------------------------------------------
def lstm_model_reference(x_btf, params):
    x = jnp.transpose(x_btf, (1, 0, 2)).astype(jnp.float32)
    B = x.shape[1]
    for layer in params["lstm"]:
        w_ih_t, w_hh_t, b = layer["w_ih_t"], layer["w_hh_t"], layer["b"]
        H = w_hh_t.shape[0]

        def step(carry, xt):
            h, c = carry
            gates = xt @ w_ih_t + h @ w_hh_t + b
            i = jax.nn.sigmoid(gates[:, 0 * H:1 * H])
            f = jax.nn.sigmoid(gates[:, 1 * H:2 * H])
            g = jnp.tanh(gates[:, 2 * H:3 * H])
            o = jax.nn.sigmoid(gates[:, 3 * H:4 * H])
            c = f * c + i * g
            h = o * jnp.tanh(c)
            return (h, c), h

        init = (jnp.zeros((B, H), jnp.float32), jnp.zeros((B, H), jnp.float32))
        _, hs = jax.lax.scan(step, init, x)
        x = hs
    return x[-1] @ params["linear"]["w_t"] + params["linear"]["b"]


# ---------------------------------------------------------------------------
if __name__ == "__main__":
    B, T = 2, 8                 # batch, sequence length (batch_first input)
    num_features = 8
    hidden_units = 32
    num_layers = 2
    output_size = 4
    dropout_rate = 0.2          # inactive at eval; num_layers handling as in module

    key = jax.random.PRNGKey(0)
    key, kx, kp = jax.random.split(key, 3)
    x = jax.random.normal(kx, (B, T, num_features), jnp.float32)
    params = init_params(kp, num_features, hidden_units, num_layers, output_size)

    y = lstm_model_forward(x, params)
    y = jax.block_until_ready(y)

    y_ref = lstm_model_reference(x, params)
    assert y.shape == (B, output_size), y.shape
    assert jnp.allclose(y, y_ref, atol=1e-4, rtol=1e-4), (y, y_ref)

    print("KERNEL_OK")
</pallas_src>

<mosaic_0001>
module attributes {stable_mosaic.version = 11 : i64} {
  func.func @_proj_kernel(%arg0: i32, %arg1: i32, %arg2: i32, %arg3: memref<64x128xf32, #tpu.memory_space<vmem>>, %arg4: memref<128x512xf32, #tpu.memory_space<vmem>>, %arg5: memref<1x512xf32, #tpu.memory_space<vmem>>, %arg6: memref<64x512xf32, #tpu.memory_space<vmem>>, %arg7: memref<64x512xf32, #tpu.memory_space<vmem>>) attributes {dimension_semantics = [#tpu.dimension_semantics<parallel>, #tpu.dimension_semantics<parallel>, #tpu.dimension_semantics<arbitrary>], iteration_bounds = array<i64: 1, 1, 1>, scalar_prefetch = 0 : i64, scratch_operands = 1 : i64, tpu.core_type = #tpu.core_type<tc>, window_params = [{transform_indices = @transform_0, window_bounds = array<i64: 64, 128>}, {transform_indices = @transform_1, window_bounds = array<i64: 128, 512>}, {transform_indices = @transform_2, window_bounds = array<i64: 1, 512>}, {transform_indices = @transform_3, window_bounds = array<i64: 64, 512>}]} {
    %c0_i32 = arith.constant 0 : i32
    %0 = arith.cmpi eq, %arg2, %c0_i32 : i32
    %1 = arith.extui %0 : i1 to i32
    %c0_i32_0 = arith.constant 0 : i32
    %2 = arith.cmpi ne, %1, %c0_i32_0 : i32
    scf.if %2 {
      %cst_10 = arith.constant 0.000000e+00 : f32
      %12 = vector.broadcast %cst_10 : f32 to vector<64x512xf32>
      %c0_11 = arith.constant 0 : index
      %c0_12 = arith.constant 0 : index
      %13 = vector.load %arg7[%c0_11, %c0_12] : memref<64x512xf32, #tpu.memory_space<vmem>>, vector<64x512xf32>
      tpu.vector_store %arg7[%c0_11, %c0_12], %12 {strides = array<i32>} : memref<64x512xf32, #tpu.memory_space<vmem>>, vector<64x512xf32>,
    } else {
    }
    %c0 = arith.constant 0 : index
    %c0_1 = arith.constant 0 : index
    %3 = vector.load %arg7[%c0, %c0_1] : memref<64x512xf32, #tpu.memory_space<vmem>>, vector<64x512xf32>
    %c0_2 = arith.constant 0 : index
    %c0_3 = arith.constant 0 : index
    %4 = vector.load %arg3[%c0_2, %c0_3] : memref<64x128xf32, #tpu.memory_space<vmem>>, vector<64x128xf32>
    %c0_4 = arith.constant 0 : index
    %c0_5 = arith.constant 0 : index
    %5 = vector.load %arg4[%c0_4, %c0_5] : memref<128x512xf32, #tpu.memory_space<vmem>>, vector<128x512xf32>
    %cst = arith.constant dense<0.000000e+00> : vector<64x512xf32>
    %6 = tpu.matmul %4, %5, %cst {dimension_numbers = #tpu.dot_dimension_numbers<[1], [0], [0], [1], [0, 0, 1, 1], [], []>} : vector<64x128xf32>, vector<128x512xf32>, vector<64x512xf32> -> vector<64x512xf32>
    %7 = arith.addf %3, %6 : vector<64x512xf32>
    %c0_6 = arith.constant 0 : index
    %c0_7 = arith.constant 0 : index
    %8 = vector.load %arg7[%c0_6, %c0_7] : memref<64x512xf32, #tpu.memory_space<vmem>>, vector<64x512xf32>
    tpu.vector_store %arg7[%c0_6, %c0_7], %7 {strides = array<i32>} : memref<64x512xf32, #tpu.memory_space<vmem>>, vector<64x512xf32>,
    %c0_i32_8 = arith.constant 0 : i32
    %9 = arith.cmpi eq, %arg2, %c0_i32_8 : i32
    %10 = arith.extui %9 : i1 to i32
    %c0_i32_9 = arith.constant 0 : i32
    %11 = arith.cmpi ne, %10, %c0_i32_9 : i32
    scf.if %11 {
      %c0_10 = arith.constant 0 : index
      %c0_11 = arith.constant 0 : index
      %12 = vector.load %arg7[%c0_10, %c0_11] : memref<64x512xf32, #tpu.memory_space<vmem>>, vector<64x512xf32>
      %c0_12 = arith.constant 0 : index
      %c0_13 = arith.constant 0 : index
      %13 = vector.load %arg5[%c0_12, %c0_13] : memref<1x512xf32, #tpu.memory_space<vmem>>, vector<1x512xf32>
      %14 = vector.broadcast %13 : vector<1x512xf32> to vector<64x512xf32>
      %15 = arith.addf %12, %14 : vector<64x512xf32>
      %c0_14 = arith.constant 0 : index
      %c0_15 = arith.constant 0 : index
      %16 = vector.load %arg6[%c0_14, %c0_15] : memref<64x512xf32, #tpu.memory_space<vmem>>, vector<64x512xf32>
      tpu.vector_store %arg6[%c0_14, %c0_15], %15 {strides = array<i32>} : memref<64x512xf32, #tpu.memory_space<vmem>>, vector<64x512xf32>,
    } else {
    }
    return
  }
  func.func @transform_0(%arg0: i32, %arg1: i32, %arg2: i32) -> (i32, i32) {
    %c0_i32 = arith.constant 0 : i32
    return %arg0, %arg2 : i32, i32
  }
  func.func @transform_1(%arg0: i32, %arg1: i32, %arg2: i32) -> (i32, i32) {
    %c0_i32 = arith.constant 0 : i32
    return %arg2, %arg1 : i32, i32
  }
  func.func @transform_2(%arg0: i32, %arg1: i32, %arg2: i32) -> (i32, i32) {
    %c0_i32 = arith.constant 0 : i32
    %c0_i32_0 = arith.constant 0 : i32
    return %c0_i32, %arg1 : i32, i32
  }
  func.func @transform_3(%arg0: i32, %arg1: i32, %arg2: i32) -> (i32, i32) {
    %c0_i32 = arith.constant 0 : i32
    return %arg0, %arg1 : i32, i32
  }
}

module attributes {stable_mosaic.version = 11 : i64} {
  func.func @_lstm_recur_kernel(%arg0: i32, %arg1: i32, %arg2: memref<8x8x512xf32, #tpu.memory_space<vmem>>, %arg3: memref<128x512xf32, #tpu.memory_space<vmem>>, %arg4: memref<8x8x128xf32, #tpu.memory_space<vmem>>, %arg5: memref<8x128xf32, #tpu.memory_space<vmem>>, %arg6: memref<8x128xf32, #tpu.memory_space<vmem>>) attributes {dimension_semantics = [#tpu.dimension_semantics<parallel>, #tpu.dimension_semantics<arbitrary>], iteration_bounds = array<i64: 1, 1>, scalar_prefetch = 0 : i64, scratch_operands = 2 : i64, tpu.core_type = #tpu.core_type<tc>, window_params = [{transform_indices = @transform_0, window_bounds = array<i64: 8, 8, 512>}, {pipeline_mode = #tpu.pipeline_mode<synchronous>, transform_indices = @transform_1, window_bounds = array<i64: 128, 512>}, {transform_indices = @transform_2, window_bounds = array<i64: 8, 8, 128>}]} {
    %c0_i32 = arith.constant 0 : i32
    %0 = arith.cmpi eq, %arg1, %c0_i32 : i32
    %1 = arith.extui %0 : i1 to i32
    %c0_i32_0 = arith.constant 0 : i32
    %2 = arith.cmpi ne, %1, %c0_i32_0 : i32
    scf.if %2 {
      %cst_130 = arith.constant 0.000000e+00 : f32
      %308 = vector.broadcast %cst_130 : f32 to vector<8x128xf32>
      %c0_131 = arith.constant 0 : index
      %c0_132 = arith.constant 0 : index
      %309 = vector.load %arg5[%c0_131, %c0_132] : memref<8x128xf32, #tpu.memory_space<vmem>>, vector<8x128xf32>
      tpu.vector_store %arg5[%c0_131, %c0_132], %308 {strides = array<i32>} : memref<8x128xf32, #tpu.memory_space<vmem>>, vector<8x128xf32>,
      %cst_133 = arith.constant 0.000000e+00 : f32
      %310 = vector.broadcast %cst_133 : f32 to vector<8x128xf32>
      %c0_134 = arith.constant 0 : index
      %c0_135 = arith.constant 0 : index
      %311 = vector.load %arg6[%c0_134, %c0_135] : memref<8x128xf32, #tpu.memory_space<vmem>>, vector<8x128xf32>
      tpu.vector_store %arg6[%c0_134, %c0_135], %310 {strides = array<i32>} : memref<8x128xf32, #tpu.memory_space<vmem>>, vector<8x128xf32>,
    } else {
    }
    %c0 = arith.constant 0 : index
    %c0_1 = arith.constant 0 : index
    %3 = vector.load %arg3[%c0, %c0_1] : memref<128x512xf32, #tpu.memory_space<vmem>>, vector<128x512xf32>
    %c0_i32_2 = arith.constant 0 : i32
    %c0_3 = arith.constant 0 : index
    %c0_4 = arith.constant 0 : index
    %4 = vector.load %arg5[%c0_3, %c0_4] : memref<8x128xf32, #tpu.memory_space<vmem>>, vector<8x128xf32>
    %c0_5 = arith.constant 0 : index
    %c0_6 = arith.constant 0 : index
    %5 = vector.load %arg6[%c0_5, %c0_6] : memref<8x128xf32, #tpu.memory_space<vmem>>, vector<8x128xf32>
    %6 = arith.index_cast %c0_i32_2 : i32 to index
    %c0_7 = arith.constant 0 : index
    %c0_8 = arith.constant 0 : index
    %7 = vector.load %arg2[%6, %c0_7, %c0_8] : memref<8x8x512xf32, #tpu.memory_space<vmem>>, vector<1x8x512xf32>
    %8 = vector.shape_cast %7 : vector<1x8x512xf32> to vector<8x512xf32>
    %cst = arith.constant dense<0.000000e+00> : vector<8x512xf32>
    %9 = tpu.matmul %4, %3, %cst {dimension_numbers = #tpu.dot_dimension_numbers<[1], [0], [0], [1], [0, 0, 1, 1], [], []>} : vector<8x128xf32>, vector<128x512xf32>, vector<8x512xf32> -> vector<8x512xf32>
    %10 = arith.addf %8, %9 : vector<8x512xf32>
    %11 = vector.extract_strided_slice %10 {offsets = [0, 0], sizes = [8, 128], strides = [1, 1]} : vector<8x512xf32> to vector<8x128xf32>
    %12 = arith.negf %11 : vector<8x128xf32>
    %13 = math.exp %12 : vector<8x128xf32>
    %cst_9 = arith.constant 1.000000e+00 : f32
    %14 = vector.broadcast %cst_9 : f32 to vector<8x128xf32>
    %15 = arith.addf %14, %13 : vector<8x128xf32>
    %16 = arith.divf %14, %15 : vector<8x128xf32>
    %17 = vector.extract_strided_slice %10 {offsets = [0, 128], sizes = [8, 128], strides = [1, 1]} : vector<8x512xf32> to vector<8x128xf32>
    %18 = arith.negf %17 : vector<8x128xf32>
    %19 = math.exp %18 : vector<8x128xf32>
    %cst_10 = arith.constant 1.000000e+00 : f32
    %20 = vector.broadcast %cst_10 : f32 to vector<8x128xf32>
    %21 = arith.addf %20, %19 : vector<8x128xf32>
    %22 = arith.divf %20, %21 : vector<8x128xf32>
    %23 = vector.extract_strided_slice %10 {offsets = [0, 256], sizes = [8, 128], strides = [1, 1]} : vector<8x512xf32> to vector<8x128xf32>
    %24 = math.tanh %23 : vector<8x128xf32>
    %25 = vector.extract_strided_slice %10 {offsets = [0, 384], sizes = [8, 128], strides = [1, 1]} : vector<8x512xf32> to vector<8x128xf32>
    %26 = arith.negf %25 : vector<8x128xf32>
    %27 = math.exp %26 : vector<8x128xf32>
    %cst_11 = arith.constant 1.000000e+00 : f32
    %28 = vector.broadcast %cst_11 : f32 to vector<8x128xf32>
    %29 = arith.addf %28, %27 : vector<8x128xf32>
    %30 = arith.divf %28, %29 : vector<8x128xf32>
    %31 = arith.mulf %22, %5 : vector<8x128xf32>
    %32 = arith.mulf %16, %24 : vector<8x128xf32>
    %33 = arith.addf %31, %32 : vector<8x128xf32>
    %34 = math.tanh %33 : vector<8x128xf32>
    %35 = arith.mulf %30, %34 : vector<8x128xf32>
    %c0_12 = arith.constant 0 : index
    %c0_13 = arith.constant 0 : index
    %36 = vector.load %arg6[%c0_12, %c0_13] : memref<8x128xf32, #tpu.memory_space<vmem>>, vector<8x128xf32>
    tpu.vector_store %arg6[%c0_12, %c0_13], %33 {strides = array<i32>} : memref<8x128xf32, #tpu.memory_space<vmem>>, vector<8x128xf32>,
    %c0_14 = arith.constant 0 : index
    %c0_15 = arith.constant 0 : index
    %37 = vector.load %arg5[%c0_14, %c0_15] : memref<8x128xf32, #tpu.memory_space<vmem>>, vector<8x128xf32>
    tpu.vector_store %arg5[%c0_14, %c0_15], %35 {strides = array<i32>} : memref<8x128xf32, #tpu.memory_space<vmem>>, vector<8x128xf32>,
    %38 = arith.index_cast %c0_i32_2 : i32 to index
    %c0_16 = arith.constant 0 : index
    %c0_17 = arith.constant 0 : index
    %39 = vector.load %arg4[%38, %c0_16, %c0_17] : memref<8x8x128xf32, #tpu.memory_space<vmem>>, vector<1x8x128xf32>
    %40 = vector.shape_cast %39 : vector<1x8x128xf32> to vector<8x128xf32>
    %41 = vector.shape_cast %35 : vector<8x128xf32> to vector<1x8x128xf32>
    tpu.vector_store %arg4[%38, %c0_16, %c0_17], %41 {strides = array<i32>} : memref<8x8x128xf32, #tpu.memory_space<vmem>>, vector<1x8x128xf32>,
    %c1_i32 = arith.constant 1 : i32
    %c0_18 = arith.constant 0 : index
    %c0_19 = arith.constant 0 : index
    %42 = vector.load %arg5[%c0_18, %c0_19] : memref<8x128xf32, #tpu.memory_space<vmem>>, vector<8x128xf32>
    %c0_20 = arith.constant 0 : index
    %c0_21 = arith.constant 0 : index
    %43 = vector.load %arg6[%c0_20, %c0_21] : memref<8x128xf32, #tpu.memory_space<vmem>>, vector<8x128xf32>
    %44 = arith.index_cast %c1_i32 : i32 to index
    %c0_22 = arith.constant 0 : index
    %c0_23 = arith.constant 0 : index
    %45 = vector.load %arg2[%44, %c0_22, %c0_23] : memref<8x8x512xf32, #tpu.memory_space<vmem>>, vector<1x8x512xf32>
    %46 = vector.shape_cast %45 : vector<1x8x512xf32> to vector<8x512xf32>
    %cst_24 = arith.constant dense<0.000000e+00> : vector<8x512xf32>
    %47 = tpu.matmul %42, %3, %cst_24 {dimension_numbers = #tpu.dot_dimension_numbers<[1], [0], [0], [1], [0, 0, 1, 1], [], []>} : vector<8x128xf32>, vector<128x512xf32>, vector<8x512xf32> -> vector<8x512xf32>
    %48 = arith.addf %46, %47 : vector<8x512xf32>
    %49 = vector.extract_strided_slice %48 {offsets = [0, 0], sizes = [8, 128], strides = [1, 1]} : vector<8x512xf32> to vector<8x128xf32>
    %50 = arith.negf %49 : vector<8x128xf32>
    %51 = math.exp %50 : vector<8x128xf32>
    %cst_25 = arith.constant 1.000000e+00 : f32
    %52 = vector.broadcast %cst_25 : f32 to vector<8x128xf32>
    %53 = arith.addf %52, %51 : vector<8x128xf32>
    %54 = arith.divf %52, %53 : vector<8x128xf32>
    %55 = vector.extract_strided_slice %48 {offsets = [0, 128], sizes = [8, 128], strides = [1, 1]} : vector<8x512xf32> to vector<8x128xf32>
    %56 = arith.negf %55 : vector<8x128xf32>
    %57 = math.exp %56 : vector<8x128xf32>
    %cst_26 = arith.constant 1.000000e+00 : f32
    %58 = vector.broadcast %cst_26 : f32 to vector<8x128xf32>
    %59 = arith.addf %58, %57 : vector<8x128xf32>
    %60 = arith.divf %58, %59 : vector<8x128xf32>
    %61 = vector.extract_strided_slice %48 {offsets = [0, 256], sizes = [8, 128], strides = [1, 1]} : vector<8x512xf32> to vector<8x128xf32>
    %62 = math.tanh %61 : vector<8x128xf32>
    %63 = vector.extract_strided_slice %48 {offsets = [0, 384], sizes = [8, 128], strides = [1, 1]} : vector<8x512xf32> to vector<8x128xf32>
    %64 = arith.negf %63 : vector<8x128xf32>
    %65 = math.exp %64 : vector<8x128xf32>
    %cst_27 = arith.constant 1.000000e+00 : f32
    %66 = vector.broadcast %cst_27 : f32 to vector<8x128xf32>
    %67 = arith.addf %66, %65 : vector<8x128xf32>
    %68 = arith.divf %66, %67 : vector<8x128xf32>
    %69 = arith.mulf %60, %43 : vector<8x128xf32>
    %70 = arith.mulf %54, %62 : vector<8x128xf32>
    %71 = arith.addf %69, %70 : vector<8x128xf32>
    %72 = math.tanh %71 : vector<8x128xf32>
    %73 = arith.mulf %68, %72 : vector<8x128xf32>
    %c0_28 = arith.constant 0 : index
    %c0_29 = arith.constant 0 : index
    %74 = vector.load %arg6[%c0_28, %c0_29] : memref<8x128xf32, #tpu.memory_space<vmem>>, vector<8x128xf32>
    tpu.vector_store %arg6[%c0_28, %c0_29], %71 {strides = array<i32>} : memref<8x128xf32, #tpu.memory_space<vmem>>, vector<8x128xf32>,
    %c0_30 = arith.constant 0 : index
    %c0_31 = arith.constant 0 : index
    %75 = vector.load %arg5[%c0_30, %c0_31] : memref<8x128xf32, #tpu.memory_space<vmem>>, vector<8x128xf32>
    tpu.vector_store %arg5[%c0_30, %c0_31], %73 {strides = array<i32>} : memref<8x128xf32, #tpu.memory_space<vmem>>, vector<8x128xf32>,
    %76 = arith.index_cast %c1_i32 : i32 to index
    %c0_32 = arith.constant 0 : index
    %c0_33 = arith.constant 0 : index
    %77 = vector.load %arg4[%76, %c0_32, %c0_33] : memref<8x8x128xf32, #tpu.memory_space<vmem>>, vector<1x8x128xf32>
    %78 = vector.shape_cast %77 : vector<1x8x128xf32> to vector<8x128xf32>
    %79 = vector.shape_cast %73 : vector<8x128xf32> to vector<1x8x128xf32>
    tpu.vector_store %arg4[%76, %c0_32, %c0_33], %79 {strides = array<i32>} : memref<8x8x128xf32, #tpu.memory_space<vmem>>, vector<1x8x128xf32>,
    %c2_i32 = arith.constant 2 : i32
    %c0_34 = arith.constant 0 : index
    %c0_35 = arith.constant 0 : index
    %80 = vector.load %arg5[%c0_34, %c0_35] : memref<8x128xf32, #tpu.memory_space<vmem>>, vector<8x128xf32>
    %c0_36 = arith.constant 0 : index
    %c0_37 = arith.constant 0 : index
    %81 = vector.load %arg6[%c0_36, %c0_37] : memref<8x128xf32, #tpu.memory_space<vmem>>, vector<8x128xf32>
    %82 = arith.index_cast %c2_i32 : i32 to index
    %c0_38 = arith.constant 0 : index
    %c0_39 = arith.constant 0 : index
    %83 = vector.load %arg2[%82, %c0_38, %c0_39] : memref<8x8x512xf32, #tpu.memory_space<vmem>>, vector<1x8x512xf32>
    %84 = vector.shape_cast %83 : vector<1x8x512xf32> to vector<8x512xf32>
    %cst_40 = arith.constant dense<0.000000e+00> : vector<8x512xf32>
    %85 = tpu.matmul %80, %3, %cst_40 {dimension_numbers = #tpu.dot_dimension_numbers<[1], [0], [0], [1], [0, 0, 1, 1], [], []>} : vector<8x128xf32>, vector<128x512xf32>, vector<8x512xf32> -> vector<8x512xf32>
    %86 = arith.addf %84, %85 : vector<8x512xf32>
    %87 = vector.extract_strided_slice %86 {offsets = [0, 0], sizes = [8, 128], strides = [1, 1]} : vector<8x512xf32> to vector<8x128xf32>
    %88 = arith.negf %87 : vector<8x128xf32>
    %89 = math.exp %88 : vector<8x128xf32>
    %cst_41 = arith.constant 1.000000e+00 : f32
    %90 = vector.broadcast %cst_41 : f32 to vector<8x128xf32>
    %91 = arith.addf %90, %89 : vector<8x128xf32>
    %92 = arith.divf %90, %91 : vector<8x128xf32>
    %93 = vector.extract_strided_slice %86 {offsets = [0, 128], sizes = [8, 128], strides = [1, 1]} : vector<8x512xf32> to vector<8x128xf32>
    %94 = arith.negf %93 : vector<8x128xf32>
    %95 = math.exp %94 : vector<8x128xf32>
    %cst_42 = arith.constant 1.000000e+00 : f32
    %96 = vector.broadcast %cst_42 : f32 to vector<8x128xf32>
    %97 = arith.addf %96, %95 : vector<8x128xf32>
    %98 = arith.divf %96, %97 : vector<8x128xf32>
    %99 = vector.extract_strided_slice %86 {offsets = [0, 256], sizes = [8, 128], strides = [1, 1]} : vector<8x512xf32> to vector<8x128xf32>
    %100 = math.tanh %99 : vector<8x128xf32>
    %101 = vector.extract_strided_slice %86 {offsets = [0, 384], sizes = [8, 128], strides = [1, 1]} : vector<8x512xf32> to vector<8x128xf32>
    %102 = arith.negf %101 : vector<8x128xf32>
    %103 = math.exp %102 : vector<8x128xf32>
    %cst_43 = arith.constant 1.000000e+00 : f32
    %104 = vector.broadcast %cst_43 : f32 to vector<8x128xf32>
    %105 = arith.addf %104, %103 : vector<8x128xf32>
    %106 = arith.divf %104, %105 : vector<8x128xf32>
    %107 = arith.mulf %98, %81 : vector<8x128xf32>
    %108 = arith.mulf %92, %100 : vector<8x128xf32>
    %109 = arith.addf %107, %108 : vector<8x128xf32>
    %110 = math.tanh %109 : vector<8x128xf32>
    %111 = arith.mulf %106, %110 : vector<8x128xf32>
    %c0_44 = arith.constant 0 : index
    %c0_45 = arith.constant 0 : index
    %112 = vector.load %arg6[%c0_44, %c0_45] : memref<8x128xf32, #tpu.memory_space<vmem>>, vector<8x128xf32>
    tpu.vector_store %arg6[%c0_44, %c0_45], %109 {strides = array<i32>} : memref<8x128xf32, #tpu.memory_space<vmem>>, vector<8x128xf32>,
    %c0_46 = arith.constant 0 : index
    %c0_47 = arith.constant 0 : index
    %113 = vector.load %arg5[%c0_46, %c0_47] : memref<8x128xf32, #tpu.memory_space<vmem>>, vector<8x128xf32>
    tpu.vector_store %arg5[%c0_46, %c0_47], %111 {strides = array<i32>} : memref<8x128xf32, #tpu.memory_space<vmem>>, vector<8x128xf32>,
    %114 = arith.index_cast %c2_i32 : i32 to index
    %c0_48 = arith.constant 0 : index
    %c0_49 = arith.constant 0 : index
    %115 = vector.load %arg4[%114, %c0_48, %c0_49] : memref<8x8x128xf32, #tpu.memory_space<vmem>>, vector<1x8x128xf32>
    %116 = vector.shape_cast %115 : vector<1x8x128xf32> to vector<8x128xf32>
    %117 = vector.shape_cast %111 : vector<8x128xf32> to vector<1x8x128xf32>
    tpu.vector_store %arg4[%114, %c0_48, %c0_49], %117 {strides = array<i32>} : memref<8x8x128xf32, #tpu.memory_space<vmem>>, vector<1x8x128xf32>,
    %c3_i32 = arith.constant 3 : i32
    %c0_50 = arith.constant 0 : index
    %c0_51 = arith.constant 0 : index
    %118 = vector.load %arg5[%c0_50, %c0_51] : memref<8x128xf32, #tpu.memory_space<vmem>>, vector<8x128xf32>
    %c0_52 = arith.constant 0 : index
    %c0_53 = arith.constant 0 : index
    %119 = vector.load %arg6[%c0_52, %c0_53] : memref<8x128xf32, #tpu.memory_space<vmem>>, vector<8x128xf32>
    %120 = arith.index_cast %c3_i32 : i32 to index
    %c0_54 = arith.constant 0 : index
    %c0_55 = arith.constant 0 : index
    %121 = vector.load %arg2[%120, %c0_54, %c0_55] : memref<8x8x512xf32, #tpu.memory_space<vmem>>, vector<1x8x512xf32>
    %122 = vector.shape_cast %121 : vector<1x8x512xf32> to vector<8x512xf32>
    %cst_56 = arith.constant dense<0.000000e+00> : vector<8x512xf32>
    %123 = tpu.matmul %118, %3, %cst_56 {dimension_numbers = #tpu.dot_dimension_numbers<[1], [0], [0], [1], [0, 0, 1, 1], [], []>} : vector<8x128xf32>, vector<128x512xf32>, vector<8x512xf32> -> vector<8x512xf32>
    %124 = arith.addf %122, %123 : vector<8x512xf32>
    %125 = vector.extract_strided_slice %124 {offsets = [0, 0], sizes = [8, 128], strides = [1, 1]} : vector<8x512xf32> to vector<8x128xf32>
    %126 = arith.negf %125 : vector<8x128xf32>
    %127 = math.exp %126 : vector<8x128xf32>
    %cst_57 = arith.constant 1.000000e+00 : f32
    %128 = vector.broadcast %cst_57 : f32 to vector<8x128xf32>
    %129 = arith.addf %128, %127 : vector<8x128xf32>
    %130 = arith.divf %128, %129 : vector<8x128xf32>
    %131 = vector.extract_strided_slice %124 {offsets = [0, 128], sizes = [8, 128], strides = [1, 1]} : vector<8x512xf32> to vector<8x128xf32>
    %132 = arith.negf %131 : vector<8x128xf32>
    %133 = math.exp %132 : vector<8x128xf32>
    %cst_58 = arith.constant 1.000000e+00 : f32
    %134 = vector.broadcast %cst_58 : f32 to vector<8x128xf32>
    %135 = arith.addf %134, %133 : vector<8x128xf32>
    %136 = arith.divf %134, %135 : vector<8x128xf32>
    %137 = vector.extract_strided_slice %124 {offsets = [0, 256], sizes = [8, 128], strides = [1, 1]} : vector<8x512xf32> to vector<8x128xf32>
    %138 = math.tanh %137 : vector<8x128xf32>
    %139 = vector.extract_strided_slice %124 {offsets = [0, 384], sizes = [8, 128], strides = [1, 1]} : vector<8x512xf32> to vector<8x128xf32>
    %140 = arith.negf %139 : vector<8x128xf32>
    %141 = math.exp %140 : vector<8x128xf32>
    %cst_59 = arith.constant 1.000000e+00 : f32
    %142 = vector.broadcast %cst_59 : f32 to vector<8x128xf32>
    %143 = arith.addf %142, %141 : vector<8x128xf32>
    %144 = arith.divf %142, %143 : vector<8x128xf32>
    %145 = arith.mulf %136, %119 : vector<8x128xf32>
    %146 = arith.mulf %130, %138 : vector<8x128xf32>
    %147 = arith.addf %145, %146 : vector<8x128xf32>
    %148 = math.tanh %147 : vector<8x128xf32>
    %149 = arith.mulf %144, %148 : vector<8x128xf32>
    %c0_60 = arith.constant 0 : index
    %c0_61 = arith.constant 0 : index
    %150 = vector.load %arg6[%c0_60, %c0_61] : memref<8x128xf32, #tpu.memory_space<vmem>>, vector<8x128xf32>
    tpu.vector_store %arg6[%c0_60, %c0_61], %147 {strides = array<i32>} : memref<8x128xf32, #tpu.memory_space<vmem>>, vector<8x128xf32>,
    %c0_62 = arith.constant 0 : index
    %c0_63 = arith.constant 0 : index
    %151 = vector.load %arg5[%c0_62, %c0_63] : memref<8x128xf32, #tpu.memory_space<vmem>>, vector<8x128xf32>
    tpu.vector_store %arg5[%c0_62, %c0_63], %149 {strides = array<i32>} : memref<8x128xf32, #tpu.memory_space<vmem>>, vector<8x128xf32>,
    %152 = arith.index_cast %c3_i32 : i32 to index
    %c0_64 = arith.constant 0 : index
    %c0_65 = arith.constant 0 : index
    %153 = vector.load %arg4[%152, %c0_64, %c0_65] : memref<8x8x128xf32, #tpu.memory_space<vmem>>, vector<1x8x128xf32>
    %154 = vector.shape_cast %153 : vector<1x8x128xf32> to vector<8x128xf32>
    %155 = vector.shape_cast %149 : vector<8x128xf32> to vector<1x8x128xf32>
    tpu.vector_store %arg4[%152, %c0_64, %c0_65], %155 {strides = array<i32>} : memref<8x8x128xf32, #tpu.memory_space<vmem>>, vector<1x8x128xf32>,
    %c4_i32 = arith.constant 4 : i32
    %c0_66 = arith.constant 0 : index
    %c0_67 = arith.constant 0 : index
    %156 = vector.load %arg5[%c0_66, %c0_67] : memref<8x128xf32, #tpu.memory_space<vmem>>, vector<8x128xf32>
    %c0_68 = arith.constant 0 : index
    %c0_69 = arith.constant 0 : index
    %157 = vector.load %arg6[%c0_68, %c0_69] : memref<8x128xf32, #tpu.memory_space<vmem>>, vector<8x128xf32>
    %158 = arith.index_cast %c4_i32 : i32 to index
    %c0_70 = arith.constant 0 : index
    %c0_71 = arith.constant 0 : index
    %159 = vector.load %arg2[%158, %c0_70, %c0_71] : memref<8x8x512xf32, #tpu.memory_space<vmem>>, vector<1x8x512xf32>
    %160 = vector.shape_cast %159 : vector<1x8x512xf32> to vector<8x512xf32>
    %cst_72 = arith.constant dense<0.000000e+00> : vector<8x512xf32>
    %161 = tpu.matmul %156, %3, %cst_72 {dimension_numbers = #tpu.dot_dimension_numbers<[1], [0], [0], [1], [0, 0, 1, 1], [], []>} : vector<8x128xf32>, vector<128x512xf32>, vector<8x512xf32> -> vector<8x512xf32>
    %162 = arith.addf %160, %161 : vector<8x512xf32>
    %163 = vector.extract_strided_slice %162 {offsets = [0, 0], sizes = [8, 128], strides = [1, 1]} : vector<8x512xf32> to vector<8x128xf32>
    %164 = arith.negf %163 : vector<8x128xf32>
    %165 = math.exp %164 : vector<8x128xf32>
    %cst_73 = arith.constant 1.000000e+00 : f32
    %166 = vector.broadcast %cst_73 : f32 to vector<8x128xf32>
    %167 = arith.addf %166, %165 : vector<8x128xf32>
    %168 = arith.divf %166, %167 : vector<8x128xf32>
    %169 = vector.extract_strided_slice %162 {offsets = [0, 128], sizes = [8, 128], strides = [1, 1]} : vector<8x512xf32> to vector<8x128xf32>
    %170 = arith.negf %169 : vector<8x128xf32>
    %171 = math.exp %170 : vector<8x128xf32>
    %cst_74 = arith.constant 1.000000e+00 : f32
    %172 = vector.broadcast %cst_74 : f32 to vector<8x128xf32>
    %173 = arith.addf %172, %171 : vector<8x128xf32>
    %174 = arith.divf %172, %173 : vector<8x128xf32>
    %175 = vector.extract_strided_slice %162 {offsets = [0, 256], sizes = [8, 128], strides = [1, 1]} : vector<8x512xf32> to vector<8x128xf32>
    %176 = math.tanh %175 : vector<8x128xf32>
    %177 = vector.extract_strided_slice %162 {offsets = [0, 384], sizes = [8, 128], strides = [1, 1]} : vector<8x512xf32> to vector<8x128xf32>
    %178 = arith.negf %177 : vector<8x128xf32>
    %179 = math.exp %178 : vector<8x128xf32>
    %cst_75 = arith.constant 1.000000e+00 : f32
    %180 = vector.broadcast %cst_75 : f32 to vector<8x128xf32>
    %181 = arith.addf %180, %179 : vector<8x128xf32>
    %182 = arith.divf %180, %181 : vector<8x128xf32>
    %183 = arith.mulf %174, %157 : vector<8x128xf32>
    %184 = arith.mulf %168, %176 : vector<8x128xf32>
    %185 = arith.addf %183, %184 : vector<8x128xf32>
    %186 = math.tanh %185 : vector<8x128xf32>
    %187 = arith.mulf %182, %186 : vector<8x128xf32>
    %c0_76 = arith.constant 0 : index
    %c0_77 = arith.constant 0 : index
    %188 = vector.load %arg6[%c0_76, %c0_77] : memref<8x128xf32, #tpu.memory_space<vmem>>, vector<8x128xf32>
    tpu.vector_store %arg6[%c0_76, %c0_77], %185 {strides = array<i32>} : memref<8x128xf32, #tpu.memory_space<vmem>>, vector<8x128xf32>,
    %c0_78 = arith.constant 0 : index
    %c0_79 = arith.constant 0 : index
    %189 = vector.load %arg5[%c0_78, %c0_79] : memref<8x128xf32, #tpu.memory_space<vmem>>, vector<8x128xf32>
    tpu.vector_store %arg5[%c0_78, %c0_79], %187 {strides = array<i32>} : memref<8x128xf32, #tpu.memory_space<vmem>>, vector<8x128xf32>,
    %190 = arith.index_cast %c4_i32 : i32 to index
    %c0_80 = arith.constant 0 : index
    %c0_81 = arith.constant 0 : index
    %191 = vector.load %arg4[%190, %c0_80, %c0_81] : memref<8x8x128xf32, #tpu.memory_space<vmem>>, vector<1x8x128xf32>
    %192 = vector.shape_cast %191 : vector<1x8x128xf32> to vector<8x128xf32>
    %193 = vector.shape_cast %187 : vector<8x128xf32> to vector<1x8x128xf32>
    tpu.vector_store %arg4[%190, %c0_80, %c0_81], %193 {strides = array<i32>} : memref<8x8x128xf32, #tpu.memory_space<vmem>>, vector<1x8x128xf32>,
    %c5_i32 = arith.constant 5 : i32
    %c0_82 = arith.constant 0 : index
    %c0_83 = arith.constant 0 : index
    %194 = vector.load %arg5[%c0_82, %c0_83] : memref<8x128xf32, #tpu.memory_space<vmem>>, vector<8x128xf32>
    %c0_84 = arith.constant 0 : index
    %c0_85 = arith.constant 0 : index
    %195 = vector.load %arg6[%c0_84, %c0_85] : memref<8x128xf32, #tpu.memory_space<vmem>>, vector<8x128xf32>
    %196 = arith.index_cast %c5_i32 : i32 to index
    %c0_86 = arith.constant 0 : index
    %c0_87 = arith.constant 0 : index
    %197 = vector.load %arg2[%196, %c0_86, %c0_87] : memref<8x8x512xf32, #tpu.memory_space<vmem>>, vector<1x8x512xf32>
    %198 = vector.shape_cast %197 : vector<1x8x512xf32> to vector<8x512xf32>
    %cst_88 = arith.constant dense<0.000000e+00> : vector<8x512xf32>
    %199 = tpu.matmul %194, %3, %cst_88 {dimension_numbers = #tpu.dot_dimension_numbers<[1], [0], [0], [1], [0, 0, 1, 1], [], []>} : vector<8x128xf32>, vector<128x512xf32>, vector<8x512xf32> -> vector<8x512xf32>
    %200 = arith.addf %198, %199 : vector<8x512xf32>
    %201 = vector.extract_strided_slice %200 {offsets = [0, 0], sizes = [8, 128], strides = [1, 1]} : vector<8x512xf32> to vector<8x128xf32>
    %202 = arith.negf %201 : vector<8x128xf32>
    %203 = math.exp %202 : vector<8x128xf32>
    %cst_89 = arith.constant 1.000000e+00 : f32
    %204 = vector.broadcast %cst_89 : f32 to vector<8x128xf32>
    %205 = arith.addf %204, %203 : vector<8x128xf32>
    %206 = arith.divf %204, %205 : vector<8x128xf32>
    %207 = vector.extract_strided_slice %200 {offsets = [0, 128], sizes = [8, 128], strides = [1, 1]} : vector<8x512xf32> to vector<8x128xf32>
    %208 = arith.negf %207 : vector<8x128xf32>
    %209 = math.exp %208 : vector<8x128xf32>
    %cst_90 = arith.constant 1.000000e+00 : f32
    %210 = vector.broadcast %cst_90 : f32 to vector<8x128xf32>
    %211 = arith.addf %210, %209 : vector<8x128xf32>
    %212 = arith.divf %210, %211 : vector<8x128xf32>
    %213 = vector.extract_strided_slice %200 {offsets = [0, 256], sizes = [8, 128], strides = [1, 1]} : vector<8x512xf32> to vector<8x128xf32>
    %214 = math.tanh %213 : vector<8x128xf32>
    %215 = vector.extract_strided_slice %200 {offsets = [0, 384], sizes = [8, 128], strides = [1, 1]} : vector<8x512xf32> to vector<8x128xf32>
    %216 = arith.negf %215 : vector<8x128xf32>
    %217 = math.exp %216 : vector<8x128xf32>
    %cst_91 = arith.constant 1.000000e+00 : f32
    %218 = vector.broadcast %cst_91 : f32 to vector<8x128xf32>
    %219 = arith.addf %218, %217 : vector<8x128xf32>
    %220 = arith.divf %218, %219 : vector<8x128xf32>
    %221 = arith.mulf %212, %195 : vector<8x128xf32>
    %222 = arith.mulf %206, %214 : vector<8x128xf32>
    %223 = arith.addf %221, %222 : vector<8x128xf32>
    %224 = math.tanh %223 : vector<8x128xf32>
    %225 = arith.mulf %220, %224 : vector<8x128xf32>
    %c0_92 = arith.constant 0 : index
    %c0_93 = arith.constant 0 : index
    %226 = vector.load %arg6[%c0_92, %c0_93] : memref<8x128xf32, #tpu.memory_space<vmem>>, vector<8x128xf32>
    tpu.vector_store %arg6[%c0_92, %c0_93], %223 {strides = array<i32>} : memref<8x128xf32, #tpu.memory_space<vmem>>, vector<8x128xf32>,
    %c0_94 = arith.constant 0 : index
    %c0_95 = arith.constant 0 : index
    %227 = vector.load %arg5[%c0_94, %c0_95] : memref<8x128xf32, #tpu.memory_space<vmem>>, vector<8x128xf32>
    tpu.vector_store %arg5[%c0_94, %c0_95], %225 {strides = array<i32>} : memref<8x128xf32, #tpu.memory_space<vmem>>, vector<8x128xf32>,
    %228 = arith.index_cast %c5_i32 : i32 to index
    %c0_96 = arith.constant 0 : index
    %c0_97 = arith.constant 0 : index
    %229 = vector.load %arg4[%228, %c0_96, %c0_97] : memref<8x8x128xf32, #tpu.memory_space<vmem>>, vector<1x8x128xf32>
    %230 = vector.shape_cast %229 : vector<1x8x128xf32> to vector<8x128xf32>
    %231 = vector.shape_cast %225 : vector<8x128xf32> to vector<1x8x128xf32>
    tpu.vector_store %arg4[%228, %c0_96, %c0_97], %231 {strides = array<i32>} : memref<8x8x128xf32, #tpu.memory_space<vmem>>, vector<1x8x128xf32>,
    %c6_i32 = arith.constant 6 : i32
    %c0_98 = arith.constant 0 : index
    %c0_99 = arith.constant 0 : index
    %232 = vector.load %arg5[%c0_98, %c0_99] : memref<8x128xf32, #tpu.memory_space<vmem>>, vector<8x128xf32>
    %c0_100 = arith.constant 0 : index
    %c0_101 = arith.constant 0 : index
    %233 = vector.load %arg6[%c0_100, %c0_101] : memref<8x128xf32, #tpu.memory_space<vmem>>, vector<8x128xf32>
    %234 = arith.index_cast %c6_i32 : i32 to index
    %c0_102 = arith.constant 0 : index
    %c0_103 = arith.constant 0 : index
    %235 = vector.load %arg2[%234, %c0_102, %c0_103] : memref<8x8x512xf32, #tpu.memory_space<vmem>>, vector<1x8x512xf32>
    %236 = vector.shape_cast %235 : vector<1x8x512xf32> to vector<8x512xf32>
    %cst_104 = arith.constant dense<0.000000e+00> : vector<8x512xf32>
    %237 = tpu.matmul %232, %3, %cst_104 {dimension_numbers = #tpu.dot_dimension_numbers<[1], [0], [0], [1], [0, 0, 1, 1], [], []>} : vector<8x128xf32>, vector<128x512xf32>, vector<8x512xf32> -> vector<8x512xf32>
    %238 = arith.addf %236, %237 : vector<8x512xf32>
    %239 = vector.extract_strided_slice %238 {offsets = [0, 0], sizes = [8, 128], strides = [1, 1]} : vector<8x512xf32> to vector<8x128xf32>
    %240 = arith.negf %239 : vector<8x128xf32>
    %241 = math.exp %240 : vector<8x128xf32>
    %cst_105 = arith.constant 1.000000e+00 : f32
    %242 = vector.broadcast %cst_105 : f32 to vector<8x128xf32>
    %243 = arith.addf %242, %241 : vector<8x128xf32>
    %244 = arith.divf %242, %243 : vector<8x128xf32>
    %245 = vector.extract_strided_slice %238 {offsets = [0, 128], sizes = [8, 128], strides = [1, 1]} : vector<8x512xf32> to vector<8x128xf32>
    %246 = arith.negf %245 : vector<8x128xf32>
    %247 = math.exp %246 : vector<8x128xf32>
    %cst_106 = arith.constant 1.000000e+00 : f32
    %248 = vector.broadcast %cst_106 : f32 to vector<8x128xf32>
    %249 = arith.addf %248, %247 : vector<8x128xf32>
    %250 = arith.divf %248, %249 : vector<8x128xf32>
    %251 = vector.extract_strided_slice %238 {offsets = [0, 256], sizes = [8, 128], strides = [1, 1]} : vector<8x512xf32> to vector<8x128xf32>
    %252 = math.tanh %251 : vector<8x128xf32>
    %253 = vector.extract_strided_slice %238 {offsets = [0, 384], sizes = [8, 128], strides = [1, 1]} : vector<8x512xf32> to vector<8x128xf32>
    %254 = arith.negf %253 : vector<8x128xf32>
    %255 = math.exp %254 : vector<8x128xf32>
    %cst_107 = arith.constant 1.000000e+00 : f32
    %256 = vector.broadcast %cst_107 : f32 to vector<8x128xf32>
    %257 = arith.addf %256, %255 : vector<8x128xf32>
    %258 = arith.divf %256, %257 : vector<8x128xf32>
    %259 = arith.mulf %250, %233 : vector<8x128xf32>
    %260 = arith.mulf %244, %252 : vector<8x128xf32>
    %261 = arith.addf %259, %260 : vector<8x128xf32>
    %262 = math.tanh %261 : vector<8x128xf32>
    %263 = arith.mulf %258, %262 : vector<8x128xf32>
    %c0_108 = arith.constant 0 : index
    %c0_109 = arith.constant 0 : index
    %264 = vector.load %arg6[%c0_108, %c0_109] : memref<8x128xf32, #tpu.memory_space<vmem>>, vector<8x128xf32>
    tpu.vector_store %arg6[%c0_108, %c0_109], %261 {strides = array<i32>} : memref<8x128xf32, #tpu.memory_space<vmem>>, vector<8x128xf32>,
    %c0_110 = arith.constant 0 : index
    %c0_111 = arith.constant 0 : index
    %265 = vector.load %arg5[%c0_110, %c0_111] : memref<8x128xf32, #tpu.memory_space<vmem>>, vector<8x128xf32>
    tpu.vector_store %arg5[%c0_110, %c0_111], %263 {strides = array<i32>} : memref<8x128xf32, #tpu.memory_space<vmem>>, vector<8x128xf32>,
    %266 = arith.index_cast %c6_i32 : i32 to index
    %c0_112 = arith.constant 0 : index
    %c0_113 = arith.constant 0 : index
    %267 = vector.load %arg4[%266, %c0_112, %c0_113] : memref<8x8x128xf32, #tpu.memory_space<vmem>>, vector<1x8x128xf32>
    %268 = vector.shape_cast %267 : vector<1x8x128xf32> to vector<8x128xf32>
    %269 = vector.shape_cast %263 : vector<8x128xf32> to vector<1x8x128xf32>
    tpu.vector_store %arg4[%266, %c0_112, %c0_113], %269 {strides = array<i32>} : memref<8x8x128xf32, #tpu.memory_space<vmem>>, vector<1x8x128xf32>,
    %c7_i32 = arith.constant 7 : i32
    %c0_114 = arith.constant 0 : index
    %c0_115 = arith.constant 0 : index
    %270 = vector.load %arg5[%c0_114, %c0_115] : memref<8x128xf32, #tpu.memory_space<vmem>>, vector<8x128xf32>
    %c0_116 = arith.constant 0 : index
    %c0_117 = arith.constant 0 : index
    %271 = vector.load %arg6[%c0_116, %c0_117] : memref<8x128xf32, #tpu.memory_space<vmem>>, vector<8x128xf32>
    %272 = arith.index_cast %c7_i32 : i32 to index
    %c0_118 = arith.constant 0 : index
    %c0_119 = arith.constant 0 : index
    %273 = vector.load %arg2[%272, %c0_118, %c0_119] : memref<8x8x512xf32, #tpu.memory_space<vmem>>, vector<1x8x512xf32>
    %274 = vector.shape_cast %273 : vector<1x8x512xf32> to vector<8x512xf32>
    %cst_120 = arith.constant dense<0.000000e+00> : vector<8x512xf32>
    %275 = tpu.matmul %270, %3, %cst_120 {dimension_numbers = #tpu.dot_dimension_numbers<[1], [0], [0], [1], [0, 0, 1, 1], [], []>} : vector<8x128xf32>, vector<128x512xf32>, vector<8x512xf32> -> vector<8x512xf32>
    %276 = arith.addf %274, %275 : vector<8x512xf32>
    %277 = vector.extract_strided_slice %276 {offsets = [0, 0], sizes = [8, 128], strides = [1, 1]} : vector<8x512xf32> to vector<8x128xf32>
    %278 = arith.negf %277 : vector<8x128xf32>
    %279 = math.exp %278 : vector<8x128xf32>
    %cst_121 = arith.constant 1.000000e+00 : f32
    %280 = vector.broadcast %cst_121 : f32 to vector<8x128xf32>
    %281 = arith.addf %280, %279 : vector<8x128xf32>
    %282 = arith.divf %280, %281 : vector<8x128xf32>
    %283 = vector.extract_strided_slice %276 {offsets = [0, 128], sizes = [8, 128], strides = [1, 1]} : vector<8x512xf32> to vector<8x128xf32>
    %284 = arith.negf %283 : vector<8x128xf32>
    %285 = math.exp %284 : vector<8x128xf32>
    %cst_122 = arith.constant 1.000000e+00 : f32
    %286 = vector.broadcast %cst_122 : f32 to vector<8x128xf32>
    %287 = arith.addf %286, %285 : vector<8x128xf32>
    %288 = arith.divf %286, %287 : vector<8x128xf32>
    %289 = vector.extract_strided_slice %276 {offsets = [0, 256], sizes = [8, 128], strides = [1, 1]} : vector<8x512xf32> to vector<8x128xf32>
    %290 = math.tanh %289 : vector<8x128xf32>
    %291 = vector.extract_strided_slice %276 {offsets = [0, 384], sizes = [8, 128], strides = [1, 1]} : vector<8x512xf32> to vector<8x128xf32>
    %292 = arith.negf %291 : vector<8x128xf32>
    %293 = math.exp %292 : vector<8x128xf32>
    %cst_123 = arith.constant 1.000000e+00 : f32
    %294 = vector.broadcast %cst_123 : f32 to vector<8x128xf32>
    %295 = arith.addf %294, %293 : vector<8x128xf32>
    %296 = arith.divf %294, %295 : vector<8x128xf32>
    %297 = arith.mulf %288, %271 : vector<8x128xf32>
    %298 = arith.mulf %282, %290 : vector<8x128xf32>
    %299 = arith.addf %297, %298 : vector<8x128xf32>
    %300 = math.tanh %299 : vector<8x128xf32>
    %301 = arith.mulf %296, %300 : vector<8x128xf32>
    %c0_124 = arith.constant 0 : index
    %c0_125 = arith.constant 0 : index
    %302 = vector.load %arg6[%c0_124, %c0_125] : memref<8x128xf32, #tpu.memory_space<vmem>>, vector<8x128xf32>
    tpu.vector_store %arg6[%c0_124, %c0_125], %299 {strides = array<i32>} : memref<8x128xf32, #tpu.memory_space<vmem>>, vector<8x128xf32>,
    %c0_126 = arith.constant 0 : index
    %c0_127 = arith.constant 0 : index
    %303 = vector.load %arg5[%c0_126, %c0_127] : memref<8x128xf32, #tpu.memory_space<vmem>>, vector<8x128xf32>
    tpu.vector_store %arg5[%c0_126, %c0_127], %301 {strides = array<i32>} : memref<8x128xf32, #tpu.memory_space<vmem>>, vector<8x128xf32>,
    %304 = arith.index_cast %c7_i32 : i32 to index
    %c0_128 = arith.constant 0 : index
    %c0_129 = arith.constant 0 : index
    %305 = vector.load %arg4[%304, %c0_128, %c0_129] : memref<8x8x128xf32, #tpu.memory_space<vmem>>, vector<1x8x128xf32>
    %306 = vector.shape_cast %305 : vector<1x8x128xf32> to vector<8x128xf32>
    %307 = vector.shape_cast %301 : vector<8x128xf32> to vector<1x8x128xf32>
    tpu.vector_store %arg4[%304, %c0_128, %c0_129], %307 {strides = array<i32>} : memref<8x8x128xf32, #tpu.memory_space<vmem>>, vector<1x8x128xf32>,
    %c8_i32 = arith.constant 8 : i32
    return
  }
  func.func @transform_0(%arg0: i32, %arg1: i32) -> (i32, i32, i32) {
    %c0_i32 = arith.constant 0 : i32
    %c0_i32_0 = arith.constant 0 : i32
    return %arg1, %arg0, %c0_i32 : i32, i32, i32
  }
  func.func @transform_1(%arg0: i32, %arg1: i32) -> (i32, i32) {
    %c0_i32 = arith.constant 0 : i32
    %c0_i32_0 = arith.constant 0 : i32
    %c0_i32_1 = arith.constant 0 : i32
    return %c0_i32, %c0_i32_0 : i32, i32
  }
  func.func @transform_2(%arg0: i32, %arg1: i32) -> (i32, i32, i32) {
    %c0_i32 = arith.constant 0 : i32
    %c0_i32_0 = arith.constant 0 : i32
    return %arg1, %arg0, %c0_i32 : i32, i32, i32
  }
}

module attributes {stable_mosaic.version = 11 : i64} {
  func.func @_proj_kernel(%arg0: i32, %arg1: i32, %arg2: i32, %arg3: memref<64x128xf32, #tpu.memory_space<vmem>>, %arg4: memref<128x512xf32, #tpu.memory_space<vmem>>, %arg5: memref<1x512xf32, #tpu.memory_space<vmem>>, %arg6: memref<64x512xf32, #tpu.memory_space<vmem>>, %arg7: memref<64x512xf32, #tpu.memory_space<vmem>>) attributes {dimension_semantics = [#tpu.dimension_semantics<parallel>, #tpu.dimension_semantics<parallel>, #tpu.dimension_semantics<arbitrary>], iteration_bounds = array<i64: 1, 1, 1>, scalar_prefetch = 0 : i64, scratch_operands = 1 : i64, tpu.core_type = #tpu.core_type<tc>, window_params = [{transform_indices = @transform_0, window_bounds = array<i64: 64, 128>}, {transform_indices = @transform_1, window_bounds = array<i64: 128, 512>}, {transform_indices = @transform_2, window_bounds = array<i64: 1, 512>}, {transform_indices = @transform_3, window_bounds = array<i64: 64, 512>}]} {
    %c0_i32 = arith.constant 0 : i32
    %0 = arith.cmpi eq, %arg2, %c0_i32 : i32
    %1 = arith.extui %0 : i1 to i32
    %c0_i32_0 = arith.constant 0 : i32
    %2 = arith.cmpi ne, %1, %c0_i32_0 : i32
    scf.if %2 {
      %cst_10 = arith.constant 0.000000e+00 : f32
      %12 = vector.broadcast %cst_10 : f32 to vector<64x512xf32>
      %c0_11 = arith.constant 0 : index
      %c0_12 = arith.constant 0 : index
      %13 = vector.load %arg7[%c0_11, %c0_12] : memref<64x512xf32, #tpu.memory_space<vmem>>, vector<64x512xf32>
      tpu.vector_store %arg7[%c0_11, %c0_12], %12 {strides = array<i32>} : memref<64x512xf32, #tpu.memory_space<vmem>>, vector<64x512xf32>,
    } else {
    }
    %c0 = arith.constant 0 : index
    %c0_1 = arith.constant 0 : index
    %3 = vector.load %arg7[%c0, %c0_1] : memref<64x512xf32, #tpu.memory_space<vmem>>, vector<64x512xf32>
    %c0_2 = arith.constant 0 : index
    %c0_3 = arith.constant 0 : index
    %4 = vector.load %arg3[%c0_2, %c0_3] : memref<64x128xf32, #tpu.memory_space<vmem>>, vector<64x128xf32>
    %c0_4 = arith.constant 0 : index
    %c0_5 = arith.constant 0 : index
    %5 = vector.load %arg4[%c0_4, %c0_5] : memref<128x512xf32, #tpu.memory_space<vmem>>, vector<128x512xf32>
    %cst = arith.constant dense<0.000000e+00> : vector<64x512xf32>
    %6 = tpu.matmul %4, %5, %cst {dimension_numbers = #tpu.dot_dimension_numbers<[1], [0], [0], [1], [0, 0, 1, 1], [], []>} : vector<64x128xf32>, vector<128x512xf32>, vector<64x512xf32> -> vector<64x512xf32>
    %7 = arith.addf %3, %6 : vector<64x512xf32>
    %c0_6 = arith.constant 0 : index
    %c0_7 = arith.constant 0 : index
    %8 = vector.load %arg7[%c0_6, %c0_7] : memref<64x512xf32, #tpu.memory_space<vmem>>, vector<64x512xf32>
    tpu.vector_store %arg7[%c0_6, %c0_7], %7 {strides = array<i32>} : memref<64x512xf32, #tpu.memory_space<vmem>>, vector<64x512xf32>,
    %c0_i32_8 = arith.constant 0 : i32
    %9 = arith.cmpi eq, %arg2, %c0_i32_8 : i32
    %10 = arith.extui %9 : i1 to i32
    %c0_i32_9 = arith.constant 0 : i32
    %11 = arith.cmpi ne, %10, %c0_i32_9 : i32
    scf.if %11 {
      %c0_10 = arith.constant 0 : index
      %c0_11 = arith.constant 0 : index
      %12 = vector.load %arg7[%c0_10, %c0_11] : memref<64x512xf32, #tpu.memory_space<vmem>>, vector<64x512xf32>
      %c0_12 = arith.constant 0 : index
      %c0_13 = arith.constant 0 : index
      %13 = vector.load %arg5[%c0_12, %c0_13] : memref<1x512xf32, #tpu.memory_space<vmem>>, vector<1x512xf32>
      %14 = vector.broadcast %13 : vector<1x512xf32> to vector<64x512xf32>
      %15 = arith.addf %12, %14 : vector<64x512xf32>
      %c0_14 = arith.constant 0 : index
      %c0_15 = arith.constant 0 : index
      %16 = vector.load %arg6[%c0_14, %c0_15] : memref<64x512xf32, #tpu.memory_space<vmem>>, vector<64x512xf32>
      tpu.vector_store %arg6[%c0_14, %c0_15], %15 {strides = array<i32>} : memref<64x512xf32, #tpu.memory_space<vmem>>, vector<64x512xf32>,
    } else {
    }
    return
  }
  func.func @transform_0(%arg0: i32, %arg1: i32, %arg2: i32) -> (i32, i32) {
    %c0_i32 = arith.constant 0 : i32
    return %arg0, %arg2 : i32, i32
  }
  func.func @transform_1(%arg0: i32, %arg1: i32, %arg2: i32) -> (i32, i32) {
    %c0_i32 = arith.constant 0 : i32
    return %arg2, %arg1 : i32, i32
  }
  func.func @transform_2(%arg0: i32, %arg1: i32, %arg2: i32) -> (i32, i32) {
    %c0_i32 = arith.constant 0 : i32
    %c0_i32_0 = arith.constant 0 : i32
    return %c0_i32, %arg1 : i32, i32
  }
  func.func @transform_3(%arg0: i32, %arg1: i32, %arg2: i32) -> (i32, i32) {
    %c0_i32 = arith.constant 0 : i32
    return %arg0, %arg1 : i32, i32
  }
}

</mosaic_0001>

<bundles_post_ra>
// kernel: lstm_model_forward.4
= control target key start
LH: loop header
LB: loop body
LE: loop exit
PB: predicated region body
PF: predicated region fallthrough
CT: control target
= control target key end

     0   :  { %8 = vsyncpa [#allocation4], 0  ;;  %s939_s0 = inlined_call_operand.vmem [shape: f32[64,128], index: 0, kind: input, shape index: {}]   ;;  %s940_s1 = inlined_call_operand.hbm [shape: f32[128,512], index: 1, kind: input, shape index: {}]   ;;  %s941_s2 = inlined_call_operand.hbm [shape: f32[1,512], index: 2, kind: input, shape index: {}]   ;;  %s942_s3 = inlined_call_operand.vmem [shape: f32[64,512], index: 3, kind: output, shape index: {}]  }
   0x1   :  { %9 = vsyncpa [#allocation6], 0  ;;  %s714_s12 = smov [#allocation3]   ;;  %s666_s16 = scalar_lea.hbm %s940_s1, 8192 }
   0x2   :  { %s17_s13 = sshll.u32 %s714_s12, 4  ;;  %p667_p0 = scmp.ne.s32.totalorder %s940_s1, %s666_s16  ;;  %s18_s13 = int_to_ptr.vmem [resolvable:$true] %s17_s13 }
   0x3   :  { %p670_p1 = scmp.lt.u32.totalorder %s666_s16, %s940_s1 }
   0x5   :  { %p672_p2 = pnand %p670_p1, %p667_p0 }
   0x7   :  { %675 = shalt.err (!%p672_p2)
}
   0x8   :  { %s676_s21 = scalar_lea.vmem %s18_s13, 8192  ;;  %p681_p4 = scmp.lt.s32.totalorder %s18_s13, %s18_s13 }
   0x9   :  { %p677_p3 = scmp.ne.s32.totalorder %s18_s13, %s676_s21  ;;  %p682_p5 = scmp.lt.s32.totalorder %s676_s21, %s676_s21 }
   0xb   :  { %p683_p6 = por %p682_p5, %p681_p4 }
   0xd   :  { %p684_p7 = pnand %p683_p6, %p677_p3 }
   0xf   :  { %687 = shalt.err (!%p684_p7)
}
  0x10   :  { %s715_s22 = smov 512   ;;  %s716_s23 = smov 32  }
  0x11   :  { %23 = dma.hbm_to_vmem [thread:$0]  %s940_s1, 8192, %s18_s13, [#allocation4], %s715_s22, %s715_s22, %s716_s23  }
  0x12   :  { %s717_s26 = smov [#allocation5]   ;;  %s688_s30 = scalar_lea.hbm %s941_s2, 64 }
  0x13   :  { %s30_s27 = sshll.u32 %s717_s26, 4  ;;  %p689_p8 = scmp.ne.s32.totalorder %s941_s2, %s688_s30  ;;  %s31_s27 = int_to_ptr.vmem [resolvable:$true] %s30_s27 }
  0x14   :  { %p692_p9 = scmp.lt.u32.totalorder %s688_s30, %s941_s2 }
  0x16   :  { %p694_p10 = pnand %p692_p9, %p689_p8 }
  0x18   :  { %697 = shalt.err (!%p694_p10)
}
  0x19   :  { %s698_s8 = scalar_lea.vmem %s31_s27, 64  ;;  %p703_p12 = scmp.lt.s32.totalorder %s31_s27, %s31_s27 }
  0x1a   :  { %p699_p11 = scmp.ne.s32.totalorder %s31_s27, %s698_s8  ;;  %p704_p13 = scmp.lt.s32.totalorder %s698_s8, %s698_s8 }
  0x1c   :  { %p705_p0 = por %p704_p13, %p703_p12 }
  0x1e   :  { %p706_p1 = pnand %p705_p0, %p699_p11 }
  0x20   :  { %709 = shalt.err (!%p706_p1)
}
  0x21   :  { %33 = dma.hbm_to_vmem [thread:$0]  %s941_s2, 64, %s31_s27, [#allocation6]  }
  0x22   :  { %710 = dma.done.wait [#allocation4], 8192  }
  0x23   :  { %711 = vsyncadd [#allocation4], 4294959104 }
  0x24   :  { %712 = dma.done.wait [#allocation6], 64  }
  0x25   :  { %713 = vsyncadd [#allocation6], 4294967232  ;;  %v718_v0 = vmov 0.0   ;;  %v117_v1 = vld [vmem:[#allocation3 + $0x8] sm:$0xff]  ;;  %v119_v3 = vld [vmem:[#allocation3 + $0x18] sm:$0xff] }
  0x26   :  { %244 = vmatprep.mubr.f32.mxu0 %v718_v0  ;;  %357 = vmatprep.mubr.f32.mxu1 %v718_v0  ;;  %v121_v2 = vld [vmem:[#allocation3 + $0x28] sm:$0xff]  ;;  %v123_v5 = vld [vmem:[#allocation3 + $0x38] sm:$0xff]  ;;  %v116_v6 = vld [vmem:[#allocation3] sm:$0xff] }
  0x27   :  { %v597_v4 = vpack.c.bf16 %v121_v2, %v117_v1  ;;  %v120_v7 = vld [vmem:[#allocation3 + $0x20] sm:$0xff]  ;;  %v629_v8 = vpack.c.bf16 %v123_v5, %v119_v3  ;;  %v118_v10 = vld [vmem:[#allocation3 + $0x10] sm:$0xff]  ;;  %v125_v12 = vld [vmem:[#allocation3 + $0x48] sm:$0xff] }
  0x28   :  { %v599_v9 = vpack.c.bf16 %v120_v7, %v116_v6  ;;  %v122_v11 = vld [vmem:[#allocation3 + $0x30] sm:$0xff]  ;;  %v129_v14 = vld [vmem:[#allocation3 + $0x68] sm:$0xff]  ;;  %v127_v15 = vld [vmem:[#allocation3 + $0x58] sm:$0xff] }
  0x29   :  { %598 = vmatprep.subr.bf16.mxu0 %v597_v4  ;;  %v631_v13 = vpack.c.bf16 %v122_v11, %v118_v10  ;;  %v131_v16 = vld [vmem:[#allocation3 + $0x78] sm:$0xff]  ;;  %630 = vmatprep.subr.bf16.mxu1 %v629_v8  ;;  %v601_v17 = vpack.c.bf16 %v129_v14, %v125_v12  ;;  %v124_v19 = vld [vmem:[#allocation3 + $0x40] sm:$0xff]  ;;  %v126_v21 = vld [vmem:[#allocation3 + $0x50] sm:$0xff] }
  0x2a   :  { %600 = vmatpush1.bf16.msra.mxu0 %v599_v9  ;;  %v633_v18 = vpack.c.bf16 %v131_v16, %v127_v15  ;;  %v128_v20 = vld [vmem:[#allocation3 + $0x60] sm:$0xff]  ;;  %v130_v23 = vld [vmem:[#allocation3 + $0x70] sm:$0xff]  ;;  %v133_v24 = vld [vmem:[#allocation3 + $0x88] sm:$0xff] }
  0x2b   :  { %632 = vmatpush1.bf16.msra.mxu1 %v631_v13  ;;  %v603_v22 = vpack.c.bf16 %v128_v20, %v124_v19  ;;  %v137_v25 = vld [vmem:[#allocation3 + $0xa8] sm:$0xff]  ;;  %602 = vmatprep.subr.bf16.mxu0 %v601_v17  ;;  %v635_v26 = vpack.c.bf16 %v130_v23, %v126_v21  ;;  %v135_v28 = vld [vmem:[#allocation3 + $0x98] sm:$0xff]  ;;  %v132_v30 = vld [vmem:[#allocation3 + $0x80] sm:$0xff] }
  0x2c   :  { %634 = vmatprep.subr.bf16.mxu1 %v633_v18  ;;  %v605_v27 = vpack.c.bf16 %v137_v25, %v133_v24  ;;  %v139_v29 = vld [vmem:[#allocation3 + $0xb8] sm:$0xff]  ;;  %v136_v32 = vld [vmem:[#allocation3 + $0xa0] sm:$0xff]  ;;  %v134_v33 = vld [vmem:[#allocation3 + $0x90] sm:$0xff] }
  0x2d   :  { %v637_v31 = vpack.c.bf16 %v139_v29, %v135_v28  ;;  %v138_v34 = vld [vmem:[#allocation3 + $0xb0] sm:$0xff]  ;;  %v607_v35 = vpack.c.bf16 %v136_v32, %v132_v30  ;;  %v141_v36 = vld [vmem:[#allocation3 + $0xc8] sm:$0xff]  ;;  %v143_v38 = vld [vmem:[#allocation3 + $0xd8] sm:$0xff] }
  0x2e   :  { %604 = vmatpush1.bf16.msra.mxu0 %v603_v22  ;;  %v145_v37 = vld [vmem:[#allocation3 + $0xe8] sm:$0xff]  ;;  %v639_v39 = vpack.c.bf16 %v138_v34, %v134_v33  ;;  %v147_v41 = vld [vmem:[#allocation3 + $0xf8] sm:$0xff]  ;;  %v140_v42 = vld [vmem:[#allocation3 + $0xc0] sm:$0xff] }
  0x2f   :  { %636 = vmatpush1.bf16.msra.mxu1 %v635_v26  ;;  %606 = vmatprep.subr.bf16.mxu0 %v605_v27  ;;  %v609_v40 = vpack.c.bf16 %v145_v37, %v141_v36  ;;  %v144_v43 = vld [vmem:[#allocation3 + $0xe0] sm:$0xff]  ;;  %v641_v44 = vpack.c.bf16 %v147_v41, %v143_v38  ;;  %v142_v45 = vld [vmem:[#allocation3 + $0xd0] sm:$0xff]  ;;  %v149_v47 = vld [vmem:[#allocation3 + $0x108] sm:$0xff] }
  0x30   :  { %638 = vmatprep.subr.bf16.mxu1 %v637_v31  ;;  %v146_v46 = vld [vmem:[#allocation3 + $0xf0] sm:$0xff]  ;;  %v153_v48 = vld [vmem:[#allocation3 + $0x128] sm:$0xff]  ;;  %v151_v49 = vld [vmem:[#allocation3 + $0x118] sm:$0xff]  ;;  %v611_v51 = vpack.c.bf16 %v144_v43, %v140_v42  ;;  %v507_v42 = vlaneseq }
  0x31   :  { %v155_v50 = vld [vmem:[#allocation3 + $0x138] sm:$0xff]  ;;  %v643_v52 = vpack.c.bf16 %v146_v46, %v142_v45  ;;  %v613_v53 = vpack.c.bf16 %v153_v48, %v149_v47  ;;  %v148_v54 = vld [vmem:[#allocation3 + $0x100] sm:$0xff]  ;;  %v150_v56 = vld [vmem:[#allocation3 + $0x110] sm:$0xff] }
  0x32   :  { %608 = vmatpush1.bf16.msra.mxu0 %v607_v35  ;;  %v152_v55 = vld [vmem:[#allocation3 + $0x120] sm:$0xff]  ;;  %v645_v57 = vpack.c.bf16 %v155_v50, %v151_v49  ;;  %v154_v58 = vld [vmem:[#allocation3 + $0x130] sm:$0xff]  ;;  %v157_v59 = vld [vmem:[#allocation3 + $0x148] sm:$0xff]  ;;  %v508_v43 = vshrl.u32 %v507_v42, 7 }
  0x33   :  { %640 = vmatpush1.bf16.msra.mxu1 %v639_v39  ;;  %610 = vmatprep.subr.bf16.mxu0 %v609_v40  ;;  %v161_v60 = vld [vmem:[#allocation3 + $0x168] sm:$0xff]  ;;  %v159_v61 = vld [vmem:[#allocation3 + $0x158] sm:$0xff]  ;;  %v615_v63 = vpack.c.bf16 %v152_v55, %v148_v54  ;;  %v647_v1 = vpack.c.bf16 %v154_v58, %v150_v56  ;;  %v156_v3 = vld [vmem:[#allocation3 + $0x140] sm:$0xff] }
  0x34   :  { %642 = vmatprep.subr.bf16.mxu1 %v641_v44  ;;  %v163_v62 = vld [vmem:[#allocation3 + $0x178] sm:$0xff]  ;;  %v617_v2 = vpack.c.bf16 %v161_v60, %v157_v59  ;;  %v160_v4 = vld [vmem:[#allocation3 + $0x160] sm:$0xff]  ;;  %v158_v5 = vld [vmem:[#allocation3 + $0x150] sm:$0xff]  ;;  %v509_v44 = vsub.s32 0, %v508_v43  ;;  %v517_v46 = vsub.s32 2, %v508_v43  ;;  %v513_v47 = vsub.s32 1, %v508_v43 }
  0x35   :  { %v649_v6 = vpack.c.bf16 %v163_v62, %v159_v61  ;;  %v162_v7 = vld [vmem:[#allocation3 + $0x170] sm:$0xff]  ;;  %v165_v8 = vld [vmem:[#allocation3 + $0x188] sm:$0xff]  ;;  %v167_v10 = vld [vmem:[#allocation3 + $0x198] sm:$0xff]  ;;  %v619_v12 = vpack.c.bf16 %v160_v4, %v156_v3  ;;  %v521_v48 = vsub.s32 3, %v508_v43 }
  0x36   :  { %612 = vmatpush1.bf16.msra.mxu0 %v611_v51  ;;  %v169_v9 = vld [vmem:[#allocation3 + $0x1a8] sm:$0xff]  ;;  %v171_v11 = vld [vmem:[#allocation3 + $0x1b8] sm:$0xff]  ;;  %v651_v13 = vpack.c.bf16 %v162_v7, %v158_v5  ;;  %v164_v15 = vld [vmem:[#allocation3 + $0x180] sm:$0xff] }
  0x37   :  { %644 = vmatpush1.bf16.msra.mxu1 %v643_v52  ;;  %614 = vmatprep.subr.bf16.mxu0 %v613_v53  ;;  %v621_v14 = vpack.c.bf16 %v169_v9, %v165_v8  ;;  %v168_v16 = vld [vmem:[#allocation3 + $0x1a0] sm:$0xff]  ;;  %v166_v17 = vld [vmem:[#allocation3 + $0x190] sm:$0xff]  ;;  %v653_v18 = vpack.c.bf16 %v171_v11, %v167_v10  ;;  %v173_v20 = vld [vmem:[#allocation3 + $0x1c8] sm:$0xff] }
  0x38   :  { %646 = vmatprep.subr.bf16.mxu1 %v645_v57  ;;  %v170_v19 = vld [vmem:[#allocation3 + $0x1b0] sm:$0xff]  ;;  %v177_v21 = vld [vmem:[#allocation3 + $0x1e8] sm:$0xff]  ;;  %v175_v22 = vld [vmem:[#allocation3 + $0x1d8] sm:$0xff]  ;;  %v623_v24 = vpack.c.bf16 %v168_v16, %v164_v15 }
  0x39   :  { %v179_v23 = vld [vmem:[#allocation3 + $0x1f8] sm:$0xff]  ;;  %v655_v25 = vpack.c.bf16 %v170_v19, %v166_v17  ;;  %v625_v26 = vpack.c.bf16 %v177_v21, %v173_v20  ;;  %v172_v27 = vld [vmem:[#allocation3 + $0x1c0] sm:$0xff]  ;;  %v174_v30 = vld [vmem:[#allocation3 + $0x1d0] sm:$0xff] }
  0x3a   :  { %616 = vmatpush1.bf16.msra.mxu0 %v615_v63  ;;  %v176_v28 = vld [vmem:[#allocation3 + $0x1e0] sm:$0xff]  ;;  %v657_v29 = vpack.c.bf16 %v179_v23, %v175_v22  ;;  %v178_v31 = vld [vmem:[#allocation3 + $0x1f0] sm:$0xff]  ;;  %v109_v35 = vld [vmem:[%s939_s0 + $0x8] sm:$0xff] }
  0x3b   :  { %648 = vmatpush1.bf16.msra.mxu1 %v647_v1  ;;  %618 = vmatprep.subr.bf16.mxu0 %v617_v2  ;;  %v627_v32 = vpack.c.bf16 %v176_v28, %v172_v27  ;;  %v659_v33 = vpack.c.bf16 %v178_v31, %v174_v30  ;;  %v108_v34 = vld [vmem:[%s939_s0] sm:$0xff]  ;;  %v110_v36 = vld [vmem:[%s939_s0 + $0x10] sm:$0xff]  ;;  %v111_v37 = vld [vmem:[%s939_s0 + $0x18] sm:$0xff] }
  0x3c   :  { %650 = vmatprep.subr.bf16.mxu1 %v649_v6  ;;  %v112_v38 = vld [vmem:[%s939_s0 + $0x20] sm:$0xff]  ;;  %v113_v39 = vld [vmem:[%s939_s0 + $0x28] sm:$0xff]  ;;  %v114_v40 = vld [vmem:[%s939_s0 + $0x30] sm:$0xff] }
  0x3d   :  { %v115_v41 = vld [vmem:[%s939_s0 + $0x38] sm:$0xff]  ;;  %v505_v45 = vld [vmem:[#allocation5] sm:$0xf] }
  0x3e   :  { %620 = vmatpush1.bf16.msra.mxu0 %v619_v12  ;;  %v803_v49 = vrot.slane %v505_v45, %v509_v44  ;;  %v805_v50 = vrot.slane %v505_v45, %v517_v46  ;;  %v807_v51 = vrot.slane %v505_v45, %v513_v47  ;;  %v809_v52 = vrot.slane %v505_v45, %v521_v48 }
  0x3f   :  { %652 = vmatpush1.bf16.msra.mxu1 %v651_v13  ;;  %622 = vmatprep.subr.bf16.mxu0 %v621_v14 }
  0x40   :  { %654 = vmatprep.subr.bf16.mxu1 %v653_v18 }
  0x42   :  { %624 = vmatpush1.bf16.msra.mxu0 %v623_v24 }
  0x43   :  { %656 = vmatpush1.bf16.msra.mxu1 %v655_v25  ;;  %626 = vmatprep.subr.bf16.mxu0 %v625_v26 }
  0x44   :  { %658 = vmatprep.subr.bf16.mxu1 %v657_v29 }
  0x46   :  { %628 = vmatpush1.bf16.msra.mxu0 %v627_v32 }
  0x47   :  { %660 = vmatpush1.bf16.msra.mxu1 %v659_v33 }
  0x49   :  { %245 = vmatmul.mubr.f32.vlgmr.msra.gmra.mrb[0].mxu0 %v108_v34 }
  0x4a   :  { %358 = vmatmul.mubr.f32.vlgmr.msra.gmra.mrb[0].mxu1 %v108_v34  ;;  %250 = vmatprep.mubr.f32.mxu0 %v718_v0 }
  0x4b   :  { %363 = vmatprep.mubr.f32.mxu1 %v718_v0 }
  0x4d   :  { %251 = vmatmul.mubr.f32.gmra.mrb[2].mxu0 %v109_v35 }
  0x4e   :  { %364 = vmatmul.mubr.f32.gmra.mrb[2].mxu1 %v109_v35  ;;  %256 = vmatprep.mubr.f32.mxu0 %v718_v0 }
  0x4f   :  { %369 = vmatprep.mubr.f32.mxu1 %v718_v0 }
  0x51   :  { %257 = vmatmul.mubr.f32.gmra.mrb[4].mxu0 %v110_v36 }
  0x52   :  { %370 = vmatmul.mubr.f32.gmra.mrb[4].mxu1 %v110_v36  ;;  %262 = vmatprep.mubr.f32.mxu0 %v718_v0 }
  0x53   :  { %375 = vmatprep.mubr.f32.mxu1 %v718_v0 }
  0x55   :  { %263 = vmatmul.mubr.f32.gmra.mrb[6].mxu0 %v111_v37 }
  0x56   :  { %376 = vmatmul.mubr.f32.gmra.mrb[6].mxu1 %v111_v37  ;;  %268 = vmatprep.mubr.f32.mxu0 %v718_v0 }
  0x57   :  { %381 = vmatprep.mubr.f32.mxu1 %v718_v0 }
  0x59   :  { %269 = vmatmul.mubr.f32.gmra.mrb[8].mxu0 %v112_v38 }
  0x5a   :  { %382 = vmatmul.mubr.f32.gmra.mrb[8].mxu1 %v112_v38  ;;  %274 = vmatprep.mubr.f32.mxu0 %v718_v0 }
  0x5b   :  { %387 = vmatprep.mubr.f32.mxu1 %v718_v0 }
  0x5d   :  { %275 = vmatmul.mubr.f32.gmra.mrb[10].mxu0 %v113_v39 }
  0x5e   :  { %388 = vmatmul.mubr.f32.gmra.mrb[10].mxu1 %v113_v39  ;;  %280 = vmatprep.mubr.f32.mxu0 %v718_v0 }
  0x5f   :  { %393 = vmatprep.mubr.f32.mxu1 %v718_v0 }
  0x61   :  { %281 = vmatmul.mubr.f32.gmra.mrb[12].mxu0 %v114_v40 }
  0x62   :  { %394 = vmatmul.mubr.f32.gmra.mrb[12].mxu1 %v114_v40  ;;  %286 = vmatprep.mubr.f32.mxu0 %v718_v0 }
  0x63   :  { %399 = vmatprep.mubr.f32.mxu1 %v718_v0 }
  0x65   :  { %287 = vmatmul.mubr.f32.gmra.mrb[14].mxu0 %v115_v41 }
  0x66   :  { %400 = vmatmul.mubr.f32.gmra.mrb[14].mxu1 %v115_v41 }
 0x11c   :  { %v246_v53 = vpop.f32.mrb[0].mxu0 }
 0x11d   :  { %v527_v0 = vadd.f32 %v803_v49, %v246_v53  ;;  %v359_v54 = vpop.f32.mrb[0].mxu1  ;;  %v248_v55 = vpop.f32.mrb[1].mxu0 }
 0x11e   :  { %v529_v56 = vadd.f32 %v805_v50, %v359_v54  ;;  %v528_v57 = vadd.f32 %v807_v51, %v248_v55  ;;  %v361_v58 = vpop.f32.mrb[1].mxu1 }
 0x11f   :  { %559 = vst [vmem:[%s942_s3] sm:$0xff] %v527_v0  ;;  %v530_v59 = vadd.f32 %v809_v52, %v361_v58 }
 0x120   :  { %561 = vst [vmem:[%s942_s3 + $0x10] sm:$0xff] %v529_v56  ;;  %560 = vst [vmem:[%s942_s3 + $0x8] sm:$0xff] %v528_v57  ;;  %v252_v60 = vpop.f32.mrb[2].mxu0 }
 0x121   :  { %562 = vst [vmem:[%s942_s3 + $0x18] sm:$0xff] %v530_v59  ;;  %v531_v61 = vadd.f32 %v803_v49, %v252_v60  ;;  %v365_v62 = vpop.f32.mrb[2].mxu1  ;;  %v254_v63 = vpop.f32.mrb[3].mxu0 }
 0x122   :  { %v533_v1 = vadd.f32 %v805_v50, %v365_v62  ;;  %v532_v2 = vadd.f32 %v807_v51, %v254_v63  ;;  %v367_v3 = vpop.f32.mrb[3].mxu1 }
 0x123   :  { %563 = vst [vmem:[%s942_s3 + $0x20] sm:$0xff] %v531_v61  ;;  %v534_v4 = vadd.f32 %v809_v52, %v367_v3 }
 0x124   :  { %565 = vst [vmem:[%s942_s3 + $0x30] sm:$0xff] %v533_v1  ;;  %564 = vst [vmem:[%s942_s3 + $0x28] sm:$0xff] %v532_v2  ;;  %v258_v5 = vpop.f32.mrb[4].mxu0 }
 0x125   :  { %566 = vst [vmem:[%s942_s3 + $0x38] sm:$0xff] %v534_v4  ;;  %v535_v6 = vadd.f32 %v803_v49, %v258_v5  ;;  %v371_v7 = vpop.f32.mrb[4].mxu1  ;;  %v260_v8 = vpop.f32.mrb[5].mxu0 }
 0x126   :  { %v537_v9 = vadd.f32 %v805_v50, %v371_v7  ;;  %v536_v10 = vadd.f32 %v807_v51, %v260_v8  ;;  %v373_v11 = vpop.f32.mrb[5].mxu1 }
 0x127   :  { %567 = vst [vmem:[%s942_s3 + $0x40] sm:$0xff] %v535_v6  ;;  %v538_v12 = vadd.f32 %v809_v52, %v373_v11 }
 0x128   :  { %569 = vst [vmem:[%s942_s3 + $0x50] sm:$0xff] %v537_v9  ;;  %568 = vst [vmem:[%s942_s3 + $0x48] sm:$0xff] %v536_v10  ;;  %v264_v13 = vpop.f32.mrb[6].mxu0 }
 0x129   :  { %570 = vst [vmem:[%s942_s3 + $0x58] sm:$0xff] %v538_v12  ;;  %v539_v14 = vadd.f32 %v803_v49, %v264_v13  ;;  %v377_v15 = vpop.f32.mrb[6].mxu1  ;;  %v266_v16 = vpop.f32.mrb[7].mxu0 }
 0x12a   :  { %v541_v17 = vadd.f32 %v805_v50, %v377_v15  ;;  %v540_v18 = vadd.f32 %v807_v51, %v266_v16  ;;  %v379_v19 = vpop.f32.mrb[7].mxu1 }
 0x12b   :  { %571 = vst [vmem:[%s942_s3 + $0x60] sm:$0xff] %v539_v14  ;;  %v542_v20 = vadd.f32 %v809_v52, %v379_v19 }
 0x12c   :  { %573 = vst [vmem:[%s942_s3 + $0x70] sm:$0xff] %v541_v17  ;;  %572 = vst [vmem:[%s942_s3 + $0x68] sm:$0xff] %v540_v18  ;;  %v270_v21 = vpop.f32.mrb[8].mxu0 }
 0x12d   :  { %574 = vst [vmem:[%s942_s3 + $0x78] sm:$0xff] %v542_v20  ;;  %v543_v22 = vadd.f32 %v803_v49, %v270_v21  ;;  %v383_v23 = vpop.f32.mrb[8].mxu1  ;;  %v272_v24 = vpop.f32.mrb[9].mxu0 }
 0x12e   :  { %v545_v25 = vadd.f32 %v805_v50, %v383_v23  ;;  %v544_v26 = vadd.f32 %v807_v51, %v272_v24  ;;  %v385_v27 = vpop.f32.mrb[9].mxu1 }
 0x12f   :  { %575 = vst [vmem:[%s942_s3 + $0x80] sm:$0xff] %v543_v22  ;;  %v546_v28 = vadd.f32 %v809_v52, %v385_v27 }
 0x130   :  { %577 = vst [vmem:[%s942_s3 + $0x90] sm:$0xff] %v545_v25  ;;  %576 = vst [vmem:[%s942_s3 + $0x88] sm:$0xff] %v544_v26  ;;  %v276_v29 = vpop.f32.mrb[10].mxu0 }
 0x131   :  { %578 = vst [vmem:[%s942_s3 + $0x98] sm:$0xff] %v546_v28  ;;  %v547_v30 = vadd.f32 %v803_v49, %v276_v29  ;;  %v389_v31 = vpop.f32.mrb[10].mxu1  ;;  %v278_v32 = vpop.f32.mrb[11].mxu0 }
 0x132   :  { %v549_v33 = vadd.f32 %v805_v50, %v389_v31  ;;  %v548_v34 = vadd.f32 %v807_v51, %v278_v32  ;;  %v391_v35 = vpop.f32.mrb[11].mxu1 }
 0x133   :  { %579 = vst [vmem:[%s942_s3 + $0xa0] sm:$0xff] %v547_v30  ;;  %v550_v36 = vadd.f32 %v809_v52, %v391_v35 }
 0x134   :  { %581 = vst [vmem:[%s942_s3 + $0xb0] sm:$0xff] %v549_v33  ;;  %580 = vst [vmem:[%s942_s3 + $0xa8] sm:$0xff] %v548_v34  ;;  %v282_v37 = vpop.f32.mrb[12].mxu0 }
 0x135   :  { %582 = vst [vmem:[%s942_s3 + $0xb8] sm:$0xff] %v550_v36  ;;  %v551_v38 = vadd.f32 %v803_v49, %v282_v37  ;;  %v395_v39 = vpop.f32.mrb[12].mxu1  ;;  %v284_v40 = vpop.f32.mrb[13].mxu0 }
 0x136   :  { %v553_v41 = vadd.f32 %v805_v50, %v395_v39  ;;  %v552_v42 = vadd.f32 %v807_v51, %v284_v40  ;;  %v397_v43 = vpop.f32.mrb[13].mxu1 }
 0x137   :  { %583 = vst [vmem:[%s942_s3 + $0xc0] sm:$0xff] %v551_v38  ;;  %v554_v44 = vadd.f32 %v809_v52, %v397_v43 }
 0x138   :  { %585 = vst [vmem:[%s942_s3 + $0xd0] sm:$0xff] %v553_v41  ;;  %584 = vst [vmem:[%s942_s3 + $0xc8] sm:$0xff] %v552_v42  ;;  %v288_v45 = vpop.f32.mrb[14].mxu0 }
 0x139   :  { %586 = vst [vmem:[%s942_s3 + $0xd8] sm:$0xff] %v554_v44  ;;  %v555_v46 = vadd.f32 %v803_v49, %v288_v45  ;;  %v401_v47 = vpop.f32.mrb[14].mxu1  ;;  %v290_v48 = vpop.f32.mrb[15].mxu0 }
 0x13a   :  { %v557_v53 = vadd.f32 %v805_v50, %v401_v47  ;;  %v556_v0 = vadd.f32 %v807_v51, %v290_v48  ;;  %v403_v54 = vpop.f32.mrb[15].mxu1 }
 0x13b   :  { %587 = vst [vmem:[%s942_s3 + $0xe0] sm:$0xff] %v555_v46  ;;  %v558_v55 = vadd.f32 %v809_v52, %v403_v54 }
 0x13c   :  { %589 = vst [vmem:[%s942_s3 + $0xf0] sm:$0xff] %v557_v53  ;;  %588 = vst [vmem:[%s942_s3 + $0xe8] sm:$0xff] %v556_v0 }
 0x13d   :  { %590 = vst [vmem:[%s942_s3 + $0xf8] sm:$0xff] %v558_v55 }
 0x13e   :  { %595 = vsyncpa [#allocation4], 1 }
 0x13f   :  { %596 = vsyncpa [#allocation6], 1 }

// kernel: lstm_model_forward.6
= control target key start
LH: loop header
LB: loop body
LE: loop exit
PB: predicated region body
PF: predicated region fallthrough
CT: control target
= control target key end

     0   :  { %v634_v3 = vmov 0.0   ;;  %s1026_s1 = inlined_call_operand.vmem [shape: f32[128,512], index: 1, kind: input, shape index: {}]   ;;  %s1027_s0 = inlined_call_operand.vmem [shape: f32[64,128], index: 0, kind: input, shape index: {}]   ;;  %s1028_s2 = inlined_call_operand.vmem [shape: f32[1,512], index: 2, kind: input, shape index: {}]   ;;  %s1029_s3 = inlined_call_operand.vmem [shape: f32[64,512], index: 3, kind: output, shape index: {}]  }
   0x1   :  { %v91_v0 = vld [vmem:[%s1026_s1 + $0x8] sm:$0xff]  ;;  %v93_v2 = vld [vmem:[%s1026_s1 + $0x18] sm:$0xff]  ;;  %218 = vmatprep.mubr.f32.mxu0 %v634_v3  ;;  %331 = vmatprep.mubr.f32.mxu1 %v634_v3  ;;  %v90_v6 = vld [vmem:[%s1026_s1] sm:$0xff] }
   0x2   :  { %v95_v1 = vld [vmem:[%s1026_s1 + $0x28] sm:$0xff]  ;;  %v97_v5 = vld [vmem:[%s1026_s1 + $0x38] sm:$0xff]  ;;  %v94_v7 = vld [vmem:[%s1026_s1 + $0x20] sm:$0xff] }
   0x3   :  { %v569_v4 = vpack.c.bf16 %v95_v1, %v91_v0  ;;  %v601_v8 = vpack.c.bf16 %v97_v5, %v93_v2  ;;  %v571_v9 = vpack.c.bf16 %v94_v7, %v90_v6  ;;  %v92_v10 = vld [vmem:[%s1026_s1 + $0x10] sm:$0xff]  ;;  %v99_v12 = vld [vmem:[%s1026_s1 + $0x48] sm:$0xff]  ;;  %v101_v15 = vld [vmem:[%s1026_s1 + $0x58] sm:$0xff] }
   0x4   :  { %v96_v11 = vld [vmem:[%s1026_s1 + $0x30] sm:$0xff]  ;;  %v103_v14 = vld [vmem:[%s1026_s1 + $0x68] sm:$0xff]  ;;  %v105_v16 = vld [vmem:[%s1026_s1 + $0x78] sm:$0xff] }
   0x5   :  { %570 = vmatprep.subr.bf16.mxu0 %v569_v4  ;;  %v603_v13 = vpack.c.bf16 %v96_v11, %v92_v10  ;;  %602 = vmatprep.subr.bf16.mxu1 %v601_v8  ;;  %v573_v17 = vpack.c.bf16 %v103_v14, %v99_v12  ;;  %v605_v18 = vpack.c.bf16 %v105_v16, %v101_v15  ;;  %v98_v19 = vld [vmem:[%s1026_s1 + $0x40] sm:$0xff]  ;;  %v100_v21 = vld [vmem:[%s1026_s1 + $0x50] sm:$0xff]  ;;  %v107_v24 = vld [vmem:[%s1026_s1 + $0x88] sm:$0xff] }
   0x6   :  { %572 = vmatpush1.bf16.msra.mxu0 %v571_v9  ;;  %v102_v20 = vld [vmem:[%s1026_s1 + $0x60] sm:$0xff]  ;;  %v104_v23 = vld [vmem:[%s1026_s1 + $0x70] sm:$0xff]  ;;  %v111_v25 = vld [vmem:[%s1026_s1 + $0xa8] sm:$0xff] }
   0x7   :  { %604 = vmatpush1.bf16.msra.mxu1 %v603_v13  ;;  %v575_v22 = vpack.c.bf16 %v102_v20, %v98_v19  ;;  %574 = vmatprep.subr.bf16.mxu0 %v573_v17  ;;  %v607_v26 = vpack.c.bf16 %v104_v23, %v100_v21  ;;  %v577_v27 = vpack.c.bf16 %v111_v25, %v107_v24  ;;  %v109_v28 = vld [vmem:[%s1026_s1 + $0x98] sm:$0xff]  ;;  %v106_v30 = vld [vmem:[%s1026_s1 + $0x80] sm:$0xff]  ;;  %v108_v33 = vld [vmem:[%s1026_s1 + $0x90] sm:$0xff] }
   0x8   :  { %606 = vmatprep.subr.bf16.mxu1 %v605_v18  ;;  %v113_v29 = vld [vmem:[%s1026_s1 + $0xb8] sm:$0xff]  ;;  %v110_v32 = vld [vmem:[%s1026_s1 + $0xa0] sm:$0xff]  ;;  %v112_v34 = vld [vmem:[%s1026_s1 + $0xb0] sm:$0xff] }
   0x9   :  { %v609_v31 = vpack.c.bf16 %v113_v29, %v109_v28  ;;  %v579_v35 = vpack.c.bf16 %v110_v32, %v106_v30  ;;  %v115_v36 = vld [vmem:[%s1026_s1 + $0xc8] sm:$0xff]  ;;  %v117_v38 = vld [vmem:[%s1026_s1 + $0xd8] sm:$0xff]  ;;  %v611_v39 = vpack.c.bf16 %v112_v34, %v108_v33  ;;  %v114_v42 = vld [vmem:[%s1026_s1 + $0xc0] sm:$0xff] }
   0xa   :  { %576 = vmatpush1.bf16.msra.mxu0 %v575_v22  ;;  %v119_v37 = vld [vmem:[%s1026_s1 + $0xe8] sm:$0xff]  ;;  %v121_v41 = vld [vmem:[%s1026_s1 + $0xf8] sm:$0xff]  ;;  %v118_v43 = vld [vmem:[%s1026_s1 + $0xe0] sm:$0xff] }
   0xb   :  { %608 = vmatpush1.bf16.msra.mxu1 %v607_v26  ;;  %578 = vmatprep.subr.bf16.mxu0 %v577_v27  ;;  %v581_v40 = vpack.c.bf16 %v119_v37, %v115_v36  ;;  %v613_v44 = vpack.c.bf16 %v121_v41, %v117_v38  ;;  %v116_v45 = vld [vmem:[%s1026_s1 + $0xd0] sm:$0xff]  ;;  %v123_v47 = vld [vmem:[%s1026_s1 + $0x108] sm:$0xff]  ;;  %v125_v49 = vld [vmem:[%s1026_s1 + $0x118] sm:$0xff]  ;;  %v583_v51 = vpack.c.bf16 %v118_v43, %v114_v42  ;;  %v481_v42 = vlaneseq }
   0xc   :  { %610 = vmatprep.subr.bf16.mxu1 %v609_v31  ;;  %v120_v46 = vld [vmem:[%s1026_s1 + $0xf0] sm:$0xff]  ;;  %v127_v48 = vld [vmem:[%s1026_s1 + $0x128] sm:$0xff]  ;;  %v129_v50 = vld [vmem:[%s1026_s1 + $0x138] sm:$0xff] }
   0xd   :  { %v615_v52 = vpack.c.bf16 %v120_v46, %v116_v45  ;;  %v585_v53 = vpack.c.bf16 %v127_v48, %v123_v47  ;;  %v122_v54 = vld [vmem:[%s1026_s1 + $0x100] sm:$0xff]  ;;  %v124_v56 = vld [vmem:[%s1026_s1 + $0x110] sm:$0xff]  ;;  %v617_v57 = vpack.c.bf16 %v129_v50, %v125_v49  ;;  %v131_v59 = vld [vmem:[%s1026_s1 + $0x148] sm:$0xff]  ;;  %v482_v43 = vshrl.u32 %v481_v42, 7 }
   0xe   :  { %580 = vmatpush1.bf16.msra.mxu0 %v579_v35  ;;  %v126_v55 = vld [vmem:[%s1026_s1 + $0x120] sm:$0xff]  ;;  %v128_v58 = vld [vmem:[%s1026_s1 + $0x130] sm:$0xff]  ;;  %v135_v60 = vld [vmem:[%s1026_s1 + $0x168] sm:$0xff] }
   0xf   :  { %612 = vmatpush1.bf16.msra.mxu1 %v611_v39  ;;  %582 = vmatprep.subr.bf16.mxu0 %v581_v40  ;;  %v133_v61 = vld [vmem:[%s1026_s1 + $0x158] sm:$0xff]  ;;  %v587_v63 = vpack.c.bf16 %v126_v55, %v122_v54  ;;  %v619_v0 = vpack.c.bf16 %v128_v58, %v124_v56  ;;  %v589_v1 = vpack.c.bf16 %v135_v60, %v131_v59  ;;  %v130_v2 = vld [vmem:[%s1026_s1 + $0x140] sm:$0xff]  ;;  %v132_v5 = vld [vmem:[%s1026_s1 + $0x150] sm:$0xff]  ;;  %v491_v46 = vsub.s32 2, %v482_v43 }
  0x10   :  { %614 = vmatprep.subr.bf16.mxu1 %v613_v44  ;;  %v137_v62 = vld [vmem:[%s1026_s1 + $0x178] sm:$0xff]  ;;  %v134_v4 = vld [vmem:[%s1026_s1 + $0x160] sm:$0xff]  ;;  %v136_v7 = vld [vmem:[%s1026_s1 + $0x170] sm:$0xff]  ;;  %v483_v44 = vsub.s32 0, %v482_v43  ;;  %v487_v47 = vsub.s32 1, %v482_v43  ;;  %v495_v48 = vsub.s32 3, %v482_v43 }
  0x11   :  { %v621_v6 = vpack.c.bf16 %v137_v62, %v133_v61  ;;  %v139_v8 = vld [vmem:[%s1026_s1 + $0x188] sm:$0xff]  ;;  %v141_v10 = vld [vmem:[%s1026_s1 + $0x198] sm:$0xff]  ;;  %v591_v12 = vpack.c.bf16 %v134_v4, %v130_v2  ;;  %v623_v13 = vpack.c.bf16 %v136_v7, %v132_v5  ;;  %v138_v15 = vld [vmem:[%s1026_s1 + $0x180] sm:$0xff] }
  0x12   :  { %584 = vmatpush1.bf16.msra.mxu0 %v583_v51  ;;  %v143_v9 = vld [vmem:[%s1026_s1 + $0x1a8] sm:$0xff]  ;;  %v145_v11 = vld [vmem:[%s1026_s1 + $0x1b8] sm:$0xff]  ;;  %v142_v16 = vld [vmem:[%s1026_s1 + $0x1a0] sm:$0xff] }
  0x13   :  { %616 = vmatpush1.bf16.msra.mxu1 %v615_v52  ;;  %586 = vmatprep.subr.bf16.mxu0 %v585_v53  ;;  %v593_v14 = vpack.c.bf16 %v143_v9, %v139_v8  ;;  %v140_v17 = vld [vmem:[%s1026_s1 + $0x190] sm:$0xff]  ;;  %v625_v18 = vpack.c.bf16 %v145_v11, %v141_v10  ;;  %v147_v20 = vld [vmem:[%s1026_s1 + $0x1c8] sm:$0xff]  ;;  %v149_v22 = vld [vmem:[%s1026_s1 + $0x1d8] sm:$0xff]  ;;  %v595_v24 = vpack.c.bf16 %v142_v16, %v138_v15 }
  0x14   :  { %618 = vmatprep.subr.bf16.mxu1 %v617_v57  ;;  %v144_v19 = vld [vmem:[%s1026_s1 + $0x1b0] sm:$0xff]  ;;  %v151_v21 = vld [vmem:[%s1026_s1 + $0x1e8] sm:$0xff]  ;;  %v153_v23 = vld [vmem:[%s1026_s1 + $0x1f8] sm:$0xff] }
  0x15   :  { %v627_v25 = vpack.c.bf16 %v144_v19, %v140_v17  ;;  %v597_v26 = vpack.c.bf16 %v151_v21, %v147_v20  ;;  %v146_v27 = vld [vmem:[%s1026_s1 + $0x1c0] sm:$0xff]  ;;  %v629_v29 = vpack.c.bf16 %v153_v23, %v149_v22  ;;  %v148_v30 = vld [vmem:[%s1026_s1 + $0x1d0] sm:$0xff]  ;;  %v83_v35 = vld [vmem:[%s1027_s0 + $0x8] sm:$0xff] }
  0x16   :  { %588 = vmatpush1.bf16.msra.mxu0 %v587_v63  ;;  %v150_v28 = vld [vmem:[%s1026_s1 + $0x1e0] sm:$0xff]  ;;  %v152_v31 = vld [vmem:[%s1026_s1 + $0x1f0] sm:$0xff]  ;;  %v85_v37 = vld [vmem:[%s1027_s0 + $0x18] sm:$0xff] }
  0x17   :  { %620 = vmatpush1.bf16.msra.mxu1 %v619_v0  ;;  %590 = vmatprep.subr.bf16.mxu0 %v589_v1  ;;  %v599_v32 = vpack.c.bf16 %v150_v28, %v146_v27  ;;  %v631_v33 = vpack.c.bf16 %v152_v31, %v148_v30  ;;  %v82_v34 = vld [vmem:[%s1027_s0] sm:$0xff]  ;;  %v84_v36 = vld [vmem:[%s1027_s0 + $0x10] sm:$0xff]  ;;  %v87_v39 = vld [vmem:[%s1027_s0 + $0x28] sm:$0xff] }
  0x18   :  { %622 = vmatprep.subr.bf16.mxu1 %v621_v6  ;;  %v86_v38 = vld [vmem:[%s1027_s0 + $0x20] sm:$0xff]  ;;  %v88_v40 = vld [vmem:[%s1027_s0 + $0x30] sm:$0xff]  ;;  %v89_v41 = vld [vmem:[%s1027_s0 + $0x38] sm:$0xff] }
  0x19   :  { %v479_v45 = vld [vmem:[%s1028_s2] sm:$0xf] }
  0x1a   :  { %592 = vmatpush1.bf16.msra.mxu0 %v591_v12  ;;  %v890_v49 = vrot.slane %v479_v45, %v483_v44  ;;  %v892_v50 = vrot.slane %v479_v45, %v491_v46  ;;  %v894_v51 = vrot.slane %v479_v45, %v487_v47  ;;  %v896_v52 = vrot.slane %v479_v45, %v495_v48 }
  0x1b   :  { %624 = vmatpush1.bf16.msra.mxu1 %v623_v13  ;;  %594 = vmatprep.subr.bf16.mxu0 %v593_v14 }
  0x1c   :  { %626 = vmatprep.subr.bf16.mxu1 %v625_v18 }
  0x1e   :  { %596 = vmatpush1.bf16.msra.mxu0 %v595_v24 }
  0x1f   :  { %628 = vmatpush1.bf16.msra.mxu1 %v627_v25  ;;  %598 = vmatprep.subr.bf16.mxu0 %v597_v26 }
  0x20   :  { %630 = vmatprep.subr.bf16.mxu1 %v629_v29 }
  0x22   :  { %600 = vmatpush1.bf16.msra.mxu0 %v599_v32 }
  0x23   :  { %632 = vmatpush1.bf16.msra.mxu1 %v631_v33 }
  0x25   :  { %219 = vmatmul.mubr.f32.vlgmr.msra.gmra.mrb[0].mxu0 %v82_v34 }
  0x26   :  { %332 = vmatmul.mubr.f32.vlgmr.msra.gmra.mrb[0].mxu1 %v82_v34  ;;  %224 = vmatprep.mubr.f32.mxu0 %v634_v3 }
  0x27   :  { %337 = vmatprep.mubr.f32.mxu1 %v634_v3 }
  0x29   :  { %225 = vmatmul.mubr.f32.gmra.mrb[2].mxu0 %v83_v35 }
  0x2a   :  { %338 = vmatmul.mubr.f32.gmra.mrb[2].mxu1 %v83_v35  ;;  %230 = vmatprep.mubr.f32.mxu0 %v634_v3 }
  0x2b   :  { %343 = vmatprep.mubr.f32.mxu1 %v634_v3 }
  0x2d   :  { %231 = vmatmul.mubr.f32.gmra.mrb[4].mxu0 %v84_v36 }
  0x2e   :  { %344 = vmatmul.mubr.f32.gmra.mrb[4].mxu1 %v84_v36  ;;  %236 = vmatprep.mubr.f32.mxu0 %v634_v3 }
  0x2f   :  { %349 = vmatprep.mubr.f32.mxu1 %v634_v3 }
  0x31   :  { %237 = vmatmul.mubr.f32.gmra.mrb[6].mxu0 %v85_v37 }
  0x32   :  { %350 = vmatmul.mubr.f32.gmra.mrb[6].mxu1 %v85_v37  ;;  %242 = vmatprep.mubr.f32.mxu0 %v634_v3 }
  0x33   :  { %355 = vmatprep.mubr.f32.mxu1 %v634_v3 }
  0x35   :  { %243 = vmatmul.mubr.f32.gmra.mrb[8].mxu0 %v86_v38 }
  0x36   :  { %356 = vmatmul.mubr.f32.gmra.mrb[8].mxu1 %v86_v38  ;;  %248 = vmatprep.mubr.f32.mxu0 %v634_v3 }
  0x37   :  { %361 = vmatprep.mubr.f32.mxu1 %v634_v3 }
  0x39   :  { %249 = vmatmul.mubr.f32.gmra.mrb[10].mxu0 %v87_v39 }
  0x3a   :  { %362 = vmatmul.mubr.f32.gmra.mrb[10].mxu1 %v87_v39  ;;  %254 = vmatprep.mubr.f32.mxu0 %v634_v3 }
  0x3b   :  { %367 = vmatprep.mubr.f32.mxu1 %v634_v3 }
  0x3d   :  { %255 = vmatmul.mubr.f32.gmra.mrb[12].mxu0 %v88_v40 }
  0x3e   :  { %368 = vmatmul.mubr.f32.gmra.mrb[12].mxu1 %v88_v40  ;;  %260 = vmatprep.mubr.f32.mxu0 %v634_v3 }
  0x3f   :  { %373 = vmatprep.mubr.f32.mxu1 %v634_v3 }
  0x41   :  { %261 = vmatmul.mubr.f32.gmra.mrb[14].mxu0 %v89_v41 }
  0x42   :  { %374 = vmatmul.mubr.f32.gmra.mrb[14].mxu1 %v89_v41 }
  0xf8   :  { %v220_v3 = vpop.f32.mrb[0].mxu0 }
  0xf9   :  { %v501_v53 = vadd.f32 %v890_v49, %v220_v3  ;;  %v333_v54 = vpop.f32.mrb[0].mxu1  ;;  %v222_v55 = vpop.f32.mrb[1].mxu0 }
  0xfa   :  { %v503_v56 = vadd.f32 %v892_v50, %v333_v54  ;;  %v502_v57 = vadd.f32 %v894_v51, %v222_v55  ;;  %v335_v58 = vpop.f32.mrb[1].mxu1 }
  0xfb   :  { %533 = vst [vmem:[%s1029_s3] sm:$0xff] %v501_v53  ;;  %v504_v59 = vadd.f32 %v896_v52, %v335_v58 }
  0xfc   :  { %535 = vst [vmem:[%s1029_s3 + $0x10] sm:$0xff] %v503_v56  ;;  %534 = vst [vmem:[%s1029_s3 + $0x8] sm:$0xff] %v502_v57  ;;  %v226_v60 = vpop.f32.mrb[2].mxu0 }
  0xfd   :  { %536 = vst [vmem:[%s1029_s3 + $0x18] sm:$0xff] %v504_v59  ;;  %v505_v61 = vadd.f32 %v890_v49, %v226_v60  ;;  %v339_v62 = vpop.f32.mrb[2].mxu1  ;;  %v228_v63 = vpop.f32.mrb[3].mxu0 }
  0xfe   :  { %v507_v0 = vadd.f32 %v892_v50, %v339_v62  ;;  %v506_v1 = vadd.f32 %v894_v51, %v228_v63  ;;  %v341_v2 = vpop.f32.mrb[3].mxu1 }
  0xff   :  { %537 = vst [vmem:[%s1029_s3 + $0x20] sm:$0xff] %v505_v61  ;;  %v508_v4 = vadd.f32 %v896_v52, %v341_v2 }
 0x100   :  { %539 = vst [vmem:[%s1029_s3 + $0x30] sm:$0xff] %v507_v0  ;;  %538 = vst [vmem:[%s1029_s3 + $0x28] sm:$0xff] %v506_v1  ;;  %v232_v5 = vpop.f32.mrb[4].mxu0 }
 0x101   :  { %540 = vst [vmem:[%s1029_s3 + $0x38] sm:$0xff] %v508_v4  ;;  %v509_v6 = vadd.f32 %v890_v49, %v232_v5  ;;  %v345_v7 = vpop.f32.mrb[4].mxu1  ;;  %v234_v8 = vpop.f32.mrb[5].mxu0 }
 0x102   :  { %v511_v9 = vadd.f32 %v892_v50, %v345_v7  ;;  %v510_v10 = vadd.f32 %v894_v51, %v234_v8  ;;  %v347_v11 = vpop.f32.mrb[5].mxu1 }
 0x103   :  { %541 = vst [vmem:[%s1029_s3 + $0x40] sm:$0xff] %v509_v6  ;;  %v512_v12 = vadd.f32 %v896_v52, %v347_v11 }
 0x104   :  { %543 = vst [vmem:[%s1029_s3 + $0x50] sm:$0xff] %v511_v9  ;;  %542 = vst [vmem:[%s1029_s3 + $0x48] sm:$0xff] %v510_v10  ;;  %v238_v13 = vpop.f32.mrb[6].mxu0 }
 0x105   :  { %544 = vst [vmem:[%s1029_s3 + $0x58] sm:$0xff] %v512_v12  ;;  %v513_v14 = vadd.f32 %v890_v49, %v238_v13  ;;  %v351_v15 = vpop.f32.mrb[6].mxu1  ;;  %v240_v16 = vpop.f32.mrb[7].mxu0 }
 0x106   :  { %v515_v17 = vadd.f32 %v892_v50, %v351_v15  ;;  %v514_v18 = vadd.f32 %v894_v51, %v240_v16  ;;  %v353_v19 = vpop.f32.mrb[7].mxu1 }
 0x107   :  { %545 = vst [vmem:[%s1029_s3 + $0x60] sm:$0xff] %v513_v14  ;;  %v516_v20 = vadd.f32 %v896_v52, %v353_v19 }
 0x108   :  { %547 = vst [vmem:[%s1029_s3 + $0x70] sm:$0xff] %v515_v17  ;;  %546 = vst [vmem:[%s1029_s3 + $0x68] sm:$0xff] %v514_v18  ;;  %v244_v21 = vpop.f32.mrb[8].mxu0 }
 0x109   :  { %548 = vst [vmem:[%s1029_s3 + $0x78] sm:$0xff] %v516_v20  ;;  %v517_v22 = vadd.f32 %v890_v49, %v244_v21  ;;  %v357_v23 = vpop.f32.mrb[8].mxu1  ;;  %v246_v24 = vpop.f32.mrb[9].mxu0 }
 0x10a   :  { %v519_v25 = vadd.f32 %v892_v50, %v357_v23  ;;  %v518_v26 = vadd.f32 %v894_v51, %v246_v24  ;;  %v359_v27 = vpop.f32.mrb[9].mxu1 }
 0x10b   :  { %549 = vst [vmem:[%s1029_s3 + $0x80] sm:$0xff] %v517_v22  ;;  %v520_v28 = vadd.f32 %v896_v52, %v359_v27 }
 0x10c   :  { %551 = vst [vmem:[%s1029_s3 + $0x90] sm:$0xff] %v519_v25  ;;  %550 = vst [vmem:[%s1029_s3 + $0x88] sm:$0xff] %v518_v26  ;;  %v250_v29 = vpop.f32.mrb[10].mxu0 }
 0x10d   :  { %552 = vst [vmem:[%s1029_s3 + $0x98] sm:$0xff] %v520_v28  ;;  %v521_v30 = vadd.f32 %v890_v49, %v250_v29  ;;  %v363_v31 = vpop.f32.mrb[10].mxu1  ;;  %v252_v32 = vpop.f32.mrb[11].mxu0 }
 0x10e   :  { %v523_v33 = vadd.f32 %v892_v50, %v363_v31  ;;  %v522_v34 = vadd.f32 %v894_v51, %v252_v32  ;;  %v365_v35 = vpop.f32.mrb[11].mxu1 }
 0x10f   :  { %553 = vst [vmem:[%s1029_s3 + $0xa0] sm:$0xff] %v521_v30  ;;  %v524_v36 = vadd.f32 %v896_v52, %v365_v35 }
 0x110   :  { %555 = vst [vmem:[%s1029_s3 + $0xb0] sm:$0xff] %v523_v33  ;;  %554 = vst [vmem:[%s1029_s3 + $0xa8] sm:$0xff] %v522_v34  ;;  %v256_v37 = vpop.f32.mrb[12].mxu0 }
 0x111   :  { %556 = vst [vmem:[%s1029_s3 + $0xb8] sm:$0xff] %v524_v36  ;;  %v525_v38 = vadd.f32 %v890_v49, %v256_v37  ;;  %v369_v39 = vpop.f32.mrb[12].mxu1  ;;  %v258_v40 = vpop.f32.mrb[13].mxu0 }
 0x112   :  { %v527_v41 = vadd.f32 %v892_v50, %v369_v39  ;;  %v526_v42 = vadd.f32 %v894_v51, %v258_v40  ;;  %v371_v43 = vpop.f32.mrb[13].mxu1 }
 0x113   :  { %557 = vst [vmem:[%s1029_s3 + $0xc0] sm:$0xff] %v525_v38  ;;  %v528_v44 = vadd.f32 %v896_v52, %v371_v43 }
 0x114   :  { %559 = vst [vmem:[%s1029_s3 + $0xd0] sm:$0xff] %v527_v41  ;;  %558 = vst [vmem:[%s1029_s3 + $0xc8] sm:$0xff] %v526_v42  ;;  %v262_v45 = vpop.f32.mrb[14].mxu0 }
 0x115   :  { %560 = vst [vmem:[%s1029_s3 + $0xd8] sm:$0xff] %v528_v44  ;;  %v529_v46 = vadd.f32 %v890_v49, %v262_v45  ;;  %v375_v47 = vpop.f32.mrb[14].mxu1  ;;  %v264_v48 = vpop.f32.mrb[15].mxu0 }
 0x116   :  { %v531_v3 = vadd.f32 %v892_v50, %v375_v47  ;;  %v530_v53 = vadd.f32 %v894_v51, %v264_v48  ;;  %v377_v54 = vpop.f32.mrb[15].mxu1 }
 0x117   :  { %561 = vst [vmem:[%s1029_s3 + $0xe0] sm:$0xff] %v529_v46  ;;  %v532_v55 = vadd.f32 %v896_v52, %v377_v54 }
 0x118   :  { %563 = vst [vmem:[%s1029_s3 + $0xf0] sm:$0xff] %v531_v3  ;;  %562 = vst [vmem:[%s1029_s3 + $0xe8] sm:$0xff] %v530_v53 }
 0x119   :  { %564 = vst [vmem:[%s1029_s3 + $0xf8] sm:$0xff] %v532_v55 }

// kernel: lstm_model_forward.5
= control target key start
LH: loop header
LB: loop body
LE: loop exit
PB: predicated region body
PF: predicated region fallthrough
CT: control target
= control target key end

     0   :  { %v2231_v3 = vmov 0.0   ;;  %s2921_s1 = inlined_call_operand.vmem [shape: f32[128,512], index: 1, kind: input, shape index: {}]   ;;  %s2922_s0 = inlined_call_operand.vmem [shape: f32[8,8,512], index: 0, kind: input, shape index: {}]   ;;  %s2923_s2 = inlined_call_operand.vmem [shape: f32[8,8,128], index: 2, kind: output, shape index: {}]  }
   0x1   :  { %v18_v0 = vld [vmem:[%s2921_s1 + $0x8] sm:$0xff]  ;;  %v17_v2 = vld [vmem:[%s2921_s1] sm:$0xff]  ;;  %151 = vmatprep.mubr.f32.mxu0 %v2231_v3  ;;  %222 = vmatprep.mubr.f32.mxu1 %v2231_v3  ;;  %v20_v19 = vld [vmem:[%s2921_s1 + $0x18] sm:$0xff] }
   0x2   :  { %v22_v1 = vld [vmem:[%s2921_s1 + $0x28] sm:$0xff]  ;;  %v21_v5 = vld [vmem:[%s2921_s1 + $0x20] sm:$0xff]  ;;  %v24_v20 = vld [vmem:[%s2921_s1 + $0x38] sm:$0xff] }
   0x3   :  { %v2258_v4 = vpack.c.bf16 %v22_v1, %v18_v0  ;;  %v26_v6 = vld [vmem:[%s2921_s1 + $0x48] sm:$0xff]  ;;  %v2269_v8 = vpack.c.bf16 %v21_v5, %v17_v2  ;;  %v25_v10 = vld [vmem:[%s2921_s1 + $0x40] sm:$0xff]  ;;  %v2310_v22 = vpack.c.bf16 %v24_v20, %v20_v19  ;;  %v19_v23 = vld [vmem:[%s2921_s1 + $0x10] sm:$0xff] }
   0x4   :  { %v30_v7 = vld [vmem:[%s2921_s1 + $0x68] sm:$0xff]  ;;  %v29_v11 = vld [vmem:[%s2921_s1 + $0x60] sm:$0xff]  ;;  %v23_v24 = vld [vmem:[%s2921_s1 + $0x30] sm:$0xff] }
   0x5   :  { %v2271_v9 = vpack.c.bf16 %v30_v7, %v26_v6  ;;  %v34_v12 = vld [vmem:[%s2921_s1 + $0x88] sm:$0xff]  ;;  %1591 = vmatprep.subr.bf16.mxu0 %v2258_v4  ;;  %v2287_v14 = vpack.c.bf16 %v29_v11, %v25_v10  ;;  %v33_v15 = vld [vmem:[%s2921_s1 + $0x80] sm:$0xff]  ;;  %v2318_v25 = vpack.c.bf16 %v23_v24, %v19_v23  ;;  %1623 = vmatprep.subr.bf16.mxu1 %v2310_v22  ;;  %v28_v27 = vld [vmem:[%s2921_s1 + $0x58] sm:$0xff] }
   0x6   :  { %v38_v13 = vld [vmem:[%s2921_s1 + $0xa8] sm:$0xff]  ;;  %1593 = vmatpush1.bf16.msra.mxu0 %v2269_v8  ;;  %v37_v16 = vld [vmem:[%s2921_s1 + $0xa0] sm:$0xff]  ;;  %v32_v28 = vld [vmem:[%s2921_s1 + $0x78] sm:$0xff] }
   0x7   :  { %1595 = vmatprep.subr.bf16.mxu0 %v2271_v9  ;;  %v2296_v17 = vpack.c.bf16 %v38_v13, %v34_v12  ;;  %v42_v18 = vld [vmem:[%s2921_s1 + $0xc8] sm:$0xff]  ;;  %v2321_v26 = vpack.c.bf16 %v37_v16, %v33_v15  ;;  %v27_v29 = vld [vmem:[%s2921_s1 + $0x50] sm:$0xff]  ;;  %v41_v31 = vld [vmem:[%s2921_s1 + $0xc0] sm:$0xff]  ;;  %1625 = vmatpush1.bf16.msra.mxu1 %v2318_v25  ;;  %v2343_v33 = vpack.c.bf16 %v32_v28, %v28_v27 }
   0x8   :  { %v46_v21 = vld [vmem:[%s2921_s1 + $0xe8] sm:$0xff]  ;;  %v45_v32 = vld [vmem:[%s2921_s1 + $0xe0] sm:$0xff]  ;;  %v31_v34 = vld [vmem:[%s2921_s1 + $0x70] sm:$0xff] }
   0x9   :  { %v2334_v30 = vpack.c.bf16 %v46_v21, %v42_v18  ;;  %v50_v35 = vld [vmem:[%s2921_s1 + $0x108] sm:$0xff]  ;;  %v2354_v37 = vpack.c.bf16 %v31_v34, %v27_v29  ;;  %v36_v38 = vld [vmem:[%s2921_s1 + $0x98] sm:$0xff]  ;;  %1627 = vmatprep.subr.bf16.mxu1 %v2343_v33  ;;  %v35_v40 = vld [vmem:[%s2921_s1 + $0x90] sm:$0xff]  ;;  %v2370_v42 = vpack.c.bf16 %v45_v32, %v41_v31 }
   0xa   :  { %1597 = vmatpush1.bf16.msra.mxu0 %v2287_v14  ;;  %v54_v36 = vld [vmem:[%s2921_s1 + $0x128] sm:$0xff]  ;;  %v40_v39 = vld [vmem:[%s2921_s1 + $0xb8] sm:$0xff]  ;;  %v39_v41 = vld [vmem:[%s2921_s1 + $0xb0] sm:$0xff] }
   0xb   :  { %1599 = vmatprep.subr.bf16.mxu0 %v2296_v17  ;;  %v49_v43 = vld [vmem:[%s2921_s1 + $0x100] sm:$0xff]  ;;  %v2378_v45 = vpack.c.bf16 %v40_v39, %v36_v38  ;;  %v2381_v46 = vpack.c.bf16 %v54_v36, %v50_v35  ;;  %1629 = vmatpush1.bf16.msra.mxu1 %v2354_v37  ;;  %v58_v47 = vld [vmem:[%s2921_s1 + $0x148] sm:$0xff]  ;;  %v2387_v48 = vpack.c.bf16 %v39_v41, %v35_v40  ;;  %v44_v49 = vld [vmem:[%s2921_s1 + $0xd8] sm:$0xff] }
   0xc   :  { %v53_v44 = vld [vmem:[%s2921_s1 + $0x120] sm:$0xff]  ;;  %v48_v50 = vld [vmem:[%s2921_s1 + $0xf8] sm:$0xff]  ;;  %v62_v51 = vld [vmem:[%s2921_s1 + $0x168] sm:$0xff] }
   0xd   :  { %1631 = vmatprep.subr.bf16.mxu1 %v2378_v45  ;;  %v2399_v52 = vpack.c.bf16 %v48_v50, %v44_v49  ;;  %v43_v53 = vld [vmem:[%s2921_s1 + $0xd0] sm:$0xff]  ;;  %v2408_v55 = vpack.c.bf16 %v53_v44, %v49_v43  ;;  %v52_v56 = vld [vmem:[%s2921_s1 + $0x118] sm:$0xff]  ;;  %v2417_v58 = vpack.c.bf16 %v62_v51, %v58_v47  ;;  %v57_v59 = vld [vmem:[%s2921_s1 + $0x140] sm:$0xff] }
   0xe   :  { %1601 = vmatpush1.bf16.msra.mxu0 %v2321_v26  ;;  %v47_v54 = vld [vmem:[%s2921_s1 + $0xf0] sm:$0xff]  ;;  %v56_v57 = vld [vmem:[%s2921_s1 + $0x138] sm:$0xff]  ;;  %v61_v60 = vld [vmem:[%s2921_s1 + $0x160] sm:$0xff] }
   0xf   :  { %1603 = vmatprep.subr.bf16.mxu0 %v2334_v30  ;;  %1633 = vmatpush1.bf16.msra.mxu1 %v2387_v48  ;;  %v66_v61 = vld [vmem:[%s2921_s1 + $0x188] sm:$0xff]  ;;  %v2429_v62 = vpack.c.bf16 %v47_v54, %v43_v53  ;;  %v2435_v0 = vpack.c.bf16 %v56_v57, %v52_v56  ;;  %v51_v1 = vld [vmem:[%s2921_s1 + $0x110] sm:$0xff]  ;;  %v60_v5 = vld [vmem:[%s2921_s1 + $0x158] sm:$0xff]  ;;  %v2450_v7 = vpack.c.bf16 %v61_v60, %v57_v59 }
  0x10   :  { %v70_v63 = vld [vmem:[%s2921_s1 + $0x1a8] sm:$0xff]  ;;  %1635 = vmatprep.subr.bf16.mxu1 %v2399_v52  ;;  %v55_v2 = vld [vmem:[%s2921_s1 + $0x130] sm:$0xff]  ;;  %v64_v6 = vld [vmem:[%s2921_s1 + $0x178] sm:$0xff] }
  0x11   :  { %v2453_v10 = vpack.c.bf16 %v70_v63, %v66_v61  ;;  %v65_v11 = vld [vmem:[%s2921_s1 + $0x180] sm:$0xff]  ;;  %v74_v13 = vld [vmem:[%s2921_s1 + $0x1c8] sm:$0xff]  ;;  %v2465_v15 = vpack.c.bf16 %v55_v2, %v51_v1  ;;  %v2471_v18 = vpack.c.bf16 %v64_v6, %v60_v5  ;;  %v59_v19 = vld [vmem:[%s2921_s1 + $0x150] sm:$0xff] }
  0x12   :  { %1605 = vmatpush1.bf16.msra.mxu0 %v2370_v42  ;;  %v69_v12 = vld [vmem:[%s2921_s1 + $0x1a0] sm:$0xff]  ;;  %v78_v16 = vld [vmem:[%s2921_s1 + $0x1e8] sm:$0xff]  ;;  %v63_v20 = vld [vmem:[%s2921_s1 + $0x170] sm:$0xff] }
  0x13   :  { %1607 = vmatprep.subr.bf16.mxu0 %v2381_v46  ;;  %1637 = vmatpush1.bf16.msra.mxu1 %v2429_v62  ;;  %v68_v21 = vld [vmem:[%s2921_s1 + $0x198] sm:$0xff]  ;;  %v2486_v24 = vpack.c.bf16 %v69_v12, %v65_v11  ;;  %v2489_v27 = vpack.c.bf16 %v78_v16, %v74_v13  ;;  %v73_v28 = vld [vmem:[%s2921_s1 + $0x1c0] sm:$0xff]  ;;  %v2498_v31 = vpack.c.bf16 %v63_v20, %v59_v19  ;;  %v67_v34 = vld [vmem:[%s2921_s1 + $0x190] sm:$0xff] }
  0x14   :  { %1639 = vmatprep.subr.bf16.mxu1 %v2435_v0  ;;  %v72_v23 = vld [vmem:[%s2921_s1 + $0x1b8] sm:$0xff]  ;;  %v77_v29 = vld [vmem:[%s2921_s1 + $0x1e0] sm:$0xff]  ;;  %v71_v35 = vld [vmem:[%s2921_s1 + $0x1b0] sm:$0xff] }
  0x15   :  { %v2501_v32 = vpack.c.bf16 %v72_v23, %v68_v21  ;;  %v76_v36 = vld [vmem:[%s2921_s1 + $0x1d8] sm:$0xff]  ;;  %v2516_v39 = vpack.c.bf16 %v77_v29, %v73_v28  ;;  %v2520_v40 = vpack.c.bf16 %v71_v35, %v67_v34  ;;  %v75_v43 = vld [vmem:[%s2921_s1 + $0x1d0] sm:$0xff]  ;;  %v83_v49 = vld [vmem:[%s2922_s0] sm:$0xff] }
  0x16   :  { %1609 = vmatpush1.bf16.msra.mxu0 %v2408_v55  ;;  %v80_v38 = vld [vmem:[%s2921_s1 + $0x1f8] sm:$0xff]  ;;  %v79_v44 = vld [vmem:[%s2921_s1 + $0x1f0] sm:$0xff]  ;;  %v84_v50 = vld [vmem:[%s2922_s0 + $0x8] sm:$0xff] }
  0x17   :  { %1611 = vmatprep.subr.bf16.mxu0 %v2417_v58  ;;  %1641 = vmatpush1.bf16.msra.mxu1 %v2465_v15  ;;  %v2523_v41 = vpack.c.bf16 %v80_v38, %v76_v36  ;;  %v2533_v47 = vpack.c.bf16 %v79_v44, %v75_v43  ;;  %v86_v60 = vld [vmem:[%s2922_s0 + $0x18] sm:$0xff]  ;;  %v85_v2 = vld [vmem:[%s2922_s0 + $0x10] sm:$0xff]  ;;  %v1534_v44 = vld [vmem:[%s2922_s0 + $0x20] sm:$0xff] }
  0x18   :  { %1643 = vmatprep.subr.bf16.mxu1 %v2471_v18 }
  0x1a   :  { %1613 = vmatpush1.bf16.msra.mxu0 %v2450_v7 }
  0x1b   :  { %1615 = vmatprep.subr.bf16.mxu0 %v2453_v10  ;;  %1645 = vmatpush1.bf16.msra.mxu1 %v2498_v31 }
  0x1c   :  { %1647 = vmatprep.subr.bf16.mxu1 %v2501_v32 }
  0x1e   :  { %1617 = vmatpush1.bf16.msra.mxu0 %v2486_v24 }
  0x1f   :  { %1619 = vmatprep.subr.bf16.mxu0 %v2489_v27  ;;  %1649 = vmatpush1.bf16.msra.mxu1 %v2520_v40 }
  0x20   :  { %1651 = vmatprep.subr.bf16.mxu1 %v2523_v41 }
  0x22   :  { %1621 = vmatpush1.bf16.msra.mxu0 %v2516_v39 }
  0x23   :  { %1655 = vmatprep.subr.bf16.mxu0 %v2258_v4  ;;  %1653 = vmatpush1.bf16.msra.mxu1 %v2533_v47 }
  0x24   :  { %1687 = vmatprep.subr.bf16.mxu1 %v2310_v22 }
  0x25   :  { %152 = vmatmul.mubr.f32.vlgmr.msra.gmra.mrb[0].mxu0 %v2231_v3 }
  0x26   :  { %1657 = vmatpush1.bf16.msra.mxu0 %v2269_v8  ;;  %331 = vmatprep.mubr.f32.mxu0 %v2231_v3 }
  0x27   :  { %1659 = vmatprep.subr.bf16.mxu0 %v2271_v9  ;;  %223 = vmatmul.mubr.f32.vlgmr.msra.gmra.mrb[0].mxu1 %v2231_v3 }
  0x28   :  { %1689 = vmatpush1.bf16.msra.mxu1 %v2318_v25  ;;  %402 = vmatprep.mubr.f32.mxu1 %v2231_v3 }
  0x29   :  { %1691 = vmatprep.subr.bf16.mxu1 %v2343_v33 }
  0x2a   :  { %1661 = vmatpush1.bf16.msra.mxu0 %v2287_v14 }
  0x2b   :  { %1663 = vmatprep.subr.bf16.mxu0 %v2296_v17 }
  0x2c   :  { %1693 = vmatpush1.bf16.msra.mxu1 %v2354_v37 }
  0x2d   :  { %1695 = vmatprep.subr.bf16.mxu1 %v2378_v45 }
  0x2e   :  { %1665 = vmatpush1.bf16.msra.mxu0 %v2321_v26 }
  0x2f   :  { %1667 = vmatprep.subr.bf16.mxu0 %v2334_v30 }
  0x30   :  { %1697 = vmatpush1.bf16.msra.mxu1 %v2387_v48 }
  0x31   :  { %1699 = vmatprep.subr.bf16.mxu1 %v2399_v52 }
  0x32   :  { %1669 = vmatpush1.bf16.msra.mxu0 %v2370_v42 }
  0x33   :  { %1671 = vmatprep.subr.bf16.mxu0 %v2381_v46 }
  0x34   :  { %1701 = vmatpush1.bf16.msra.mxu1 %v2429_v62 }
  0x35   :  { %1703 = vmatprep.subr.bf16.mxu1 %v2435_v0 }
  0x36   :  { %1673 = vmatpush1.bf16.msra.mxu0 %v2408_v55 }
  0x37   :  { %1675 = vmatprep.subr.bf16.mxu0 %v2417_v58 }
  0x38   :  { %1705 = vmatpush1.bf16.msra.mxu1 %v2465_v15 }
  0x39   :  { %1707 = vmatprep.subr.bf16.mxu1 %v2471_v18 }
  0x3a   :  { %1677 = vmatpush1.bf16.msra.mxu0 %v2450_v7 }
  0x3b   :  { %1679 = vmatprep.subr.bf16.mxu0 %v2453_v10 }
  0x3c   :  { %1709 = vmatpush1.bf16.msra.mxu1 %v2498_v31 }
  0x3d   :  { %1711 = vmatprep.subr.bf16.mxu1 %v2501_v32 }
  0x3e   :  { %1681 = vmatpush1.bf16.msra.mxu0 %v2486_v24 }
  0x3f   :  { %1683 = vmatprep.subr.bf16.mxu0 %v2489_v27 }
  0x40   :  { %1713 = vmatpush1.bf16.msra.mxu1 %v2520_v40 }
  0x41   :  { %1715 = vmatprep.subr.bf16.mxu1 %v2523_v41 }
  0x42   :  { %1685 = vmatpush1.bf16.msra.mxu0 %v2516_v39 }
  0x43   :  { %1719 = vmatprep.subr.bf16.mxu0 %v2258_v4 }
  0x44   :  { %1717 = vmatpush1.bf16.msra.mxu1 %v2533_v47 }
  0x45   :  { %1751 = vmatprep.subr.bf16.mxu1 %v2310_v22 }
  0xf8   :  { %v153_v51 = vpop.f32.mrb[0].mxu0 }
  0xf9   :  { %v229_v53 = vadd.f32 %v153_v51, %v83_v49  ;;  %v155_v54 = vpop.f32.mrb[1].mxu0  ;;  %v1535_v49 = vld [vmem:[%s2922_s0 + $0x28] sm:$0xff] }
  0xfa   :  { %v230_v56 = vadd.f32 %v155_v54, %v84_v50  ;;  %v224_v61 = vpop.f32.mrb[0].mxu1 }
  0xfb   :  { %v1531_v57 = vmul.f32 -1.442695, %v229_v53  ;;  %v226_v63 = vpop.f32.mrb[1].mxu1  ;;  %v231_v6 = vadd.f32 %v224_v61, %v85_v2  ;;  %v1537_v61 = vld [vmem:[%s2922_s0 + $0x38] sm:$0xff] }
  0xfc   :  { %v1532_v59 = vmul.f32 -1.442695, %v230_v56  ;;  %v232_v1 = vadd.f32 %v226_v63, %v86_v60 }
  0xfd   :  { %2103 = vpow2.f32 %v1531_v57 }
  0xfe   :  { %2105 = vpow2.f32 %v1532_v59  ;;  %v1533_v5 = vmul.f32 -1.442695, %v232_v1  ;;  %v1536_v1 = vld [vmem:[%s2922_s0 + $0x30] sm:$0xff] }
 0x100   :  { %2107 = vpow2.f32 %v1533_v5 }
 0x101   :  { %2109 = vtanh.f32 %v231_v6 }
 0x107   :  { %v2104_v11 = vpop.eup %2103 }
 0x108   :  { %v2106_v12 = vpop.eup %2105  ;;  %v236_v13 = vadd.f32 1.0, %v2104_v11 }
 0x109   :  { %v242_v16 = vadd.f32 1.0, %v2106_v12 }
 0x10a   :  { %2111 = vrcp.f32 %v236_v13  ;;  %v2108_v19 = vpop.eup %2107 }
 0x10b   :  { %2113 = vrcp.f32 %v242_v16  ;;  %v2110_v20 = vpop.eup %2109  ;;  %v249_v23 = vadd.f32 1.0, %v2108_v19 }
 0x10d   :  { %2115 = vrcp.f32 %v249_v23 }
 0x114   :  { %v2112_v21 = vpop.eup %2111 }
 0x115   :  { %v2114_v28 = vpop.eup %2113  ;;  %v253_v29 = vmul.f32 %v2112_v21, %v2110_v20 }
 0x116   :  { %v252_v34 = vmul.f32 0.0, %v2114_v28 }
 0x117   :  { %v2116_v36 = vpop.eup %2115 }
 0x118   :  { %v2587_v35 = vadd.f32 %v253_v29, %v252_v34 }
 0x11a   :  { %2117 = vtanh.f32 %v2587_v35 }
 0x124   :  { %v2118_v38 = vpop.eup %2117 }
 0x125   :  { %v256_v43 = vmul.f32 %v2118_v38, %v2116_v36 }
 0x127   :  { %259 = vst [vmem:[%s2923_s2] sm:$0xff] %v256_v43  ;;  %332 = vmatmul.mubr.f32.vlgmr.msra.gmra.mrb[2].mxu0 %v256_v43  ;;  %403 = vmatmul.mubr.f32.vlgmr.msra.gmra.mrb[2].mxu1 %v256_v43 }
 0x128   :  { %1721 = vmatpush1.bf16.msra.mxu0 %v2269_v8  ;;  %1753 = vmatpush1.bf16.msra.mxu1 %v2318_v25 }
 0x129   :  { %1723 = vmatprep.subr.bf16.mxu0 %v2271_v9  ;;  %1755 = vmatprep.subr.bf16.mxu1 %v2343_v33 }
 0x12a   :  { %512 = vmatprep.mubr.f32.mxu0 %v2231_v3  ;;  %583 = vmatprep.mubr.f32.mxu1 %v2231_v3 }
 0x12c   :  { %1725 = vmatpush1.bf16.msra.mxu0 %v2287_v14  ;;  %1757 = vmatpush1.bf16.msra.mxu1 %v2354_v37 }
 0x12d   :  { %1727 = vmatprep.subr.bf16.mxu0 %v2296_v17  ;;  %1759 = vmatprep.subr.bf16.mxu1 %v2378_v45 }
 0x130   :  { %1729 = vmatpush1.bf16.msra.mxu0 %v2321_v26  ;;  %1761 = vmatpush1.bf16.msra.mxu1 %v2387_v48 }
 0x131   :  { %1731 = vmatprep.subr.bf16.mxu0 %v2334_v30  ;;  %1763 = vmatprep.subr.bf16.mxu1 %v2399_v52 }
 0x134   :  { %1733 = vmatpush1.bf16.msra.mxu0 %v2370_v42  ;;  %1765 = vmatpush1.bf16.msra.mxu1 %v2429_v62 }
 0x135   :  { %1735 = vmatprep.subr.bf16.mxu0 %v2381_v46  ;;  %1767 = vmatprep.subr.bf16.mxu1 %v2435_v0 }
 0x138   :  { %1737 = vmatpush1.bf16.msra.mxu0 %v2408_v55  ;;  %1769 = vmatpush1.bf16.msra.mxu1 %v2465_v15 }
 0x139   :  { %1739 = vmatprep.subr.bf16.mxu0 %v2417_v58  ;;  %1771 = vmatprep.subr.bf16.mxu1 %v2471_v18 }
 0x13c   :  { %1741 = vmatpush1.bf16.msra.mxu0 %v2450_v7  ;;  %1773 = vmatpush1.bf16.msra.mxu1 %v2498_v31 }
 0x13d   :  { %1743 = vmatprep.subr.bf16.mxu0 %v2453_v10  ;;  %1775 = vmatprep.subr.bf16.mxu1 %v2501_v32 }
 0x140   :  { %1745 = vmatpush1.bf16.msra.mxu0 %v2486_v24  ;;  %1777 = vmatpush1.bf16.msra.mxu1 %v2520_v40 }
 0x141   :  { %1747 = vmatprep.subr.bf16.mxu0 %v2489_v27  ;;  %1779 = vmatprep.subr.bf16.mxu1 %v2523_v41 }
 0x144   :  { %1749 = vmatpush1.bf16.msra.mxu0 %v2516_v39  ;;  %1781 = vmatpush1.bf16.msra.mxu1 %v2533_v47 }
 0x145   :  { %1783 = vmatprep.subr.bf16.mxu0 %v2258_v4  ;;  %1815 = vmatprep.subr.bf16.mxu1 %v2310_v22 }
 0x1fa   :  { %v333_v50 = vpop.f32.mrb[2].mxu0  ;;  %v404_v51 = vpop.f32.mrb[2].mxu1 }
 0x1fb   :  { %v409_v53 = vadd.f32 %v1534_v44, %v333_v50  ;;  %v335_v54 = vpop.f32.mrb[3].mxu0  ;;  %v406_v56 = vpop.f32.mrb[3].mxu1  ;;  %v411_v5 = vadd.f32 %v1536_v1, %v404_v51  ;;  %v1543_v44 = vld [vmem:[%s2922_s0 + $0x48] sm:$0xff] }
 0x1fc   :  { %v410_v57 = vadd.f32 %v1535_v49, %v335_v54  ;;  %v412_v63 = vadd.f32 %v1537_v61, %v406_v56 }
 0x1fd   :  { %v1538_v59 = vmul.f32 -1.442695, %v409_v53 }
 0x1fe   :  { %v1539_v60 = vmul.f32 -1.442695, %v410_v57  ;;  %v1540_v2 = vmul.f32 -1.442695, %v412_v63  ;;  %v1544_v63 = vld [vmem:[%s2922_s0 + $0x50] sm:$0xff] }
 0x1ff   :  { %2119 = vpow2.f32 %v1538_v59 }
 0x200   :  { %2121 = vpow2.f32 %v1539_v60  ;;  %v1545_v60 = vld [vmem:[%s2922_s0 + $0x58] sm:$0xff] }
 0x201   :  { %2123 = vpow2.f32 %v1540_v2 }
 0x202   :  { %2125 = vtanh.f32 %v411_v5 }
 0x209   :  { %v2120_v6 = vpop.eup %2119 }
 0x20a   :  { %v2122_v11 = vpop.eup %2121  ;;  %v416_v12 = vadd.f32 1.0, %v2120_v6 }
 0x20b   :  { %v422_v13 = vadd.f32 1.0, %v2122_v11  ;;  %v2124_v16 = vpop.eup %2123 }
 0x20c   :  { %2127 = vrcp.f32 %v416_v12  ;;  %v2126_v19 = vpop.eup %2125  ;;  %v429_v28 = vadd.f32 1.0, %v2124_v16 }
 0x20d   :  { %2129 = vrcp.f32 %v422_v13 }
 0x20e   :  { %2131 = vrcp.f32 %v429_v28 }
 0x216   :  { %v2128_v20 = vpop.eup %2127 }
 0x217   :  { %v2130_v21 = vpop.eup %2129  ;;  %v433_v23 = vmul.f32 %v2128_v20, %v2126_v19 }
 0x218   :  { %v432_v29 = vmul.f32 %v2130_v21, %v2587_v35  ;;  %v2132_v36 = vpop.eup %2131  ;;  %v1542_v35 = vld [vmem:[%s2922_s0 + $0x40] sm:$0xff] }
 0x21a   :  { %v2640_v34 = vadd.f32 %v433_v23, %v432_v29 }
 0x21c   :  { %2133 = vtanh.f32 %v2640_v34 }
 0x226   :  { %v2134_v38 = vpop.eup %2133 }
 0x227   :  { %v436_v43 = vmul.f32 %v2134_v38, %v2132_v36 }
 0x229   :  { %1541 = vst [vmem:[%s2923_s2 + $0x8] sm:$0xff] %v436_v43  ;;  %513 = vmatmul.mubr.f32.vlgmr.msra.gmra.mrb[4].mxu0 %v436_v43  ;;  %584 = vmatmul.mubr.f32.vlgmr.msra.gmra.mrb[4].mxu1 %v436_v43 }
 0x22a   :  { %1785 = vmatpush1.bf16.msra.mxu0 %v2269_v8  ;;  %1817 = vmatpush1.bf16.msra.mxu1 %v2318_v25 }
 0x22b   :  { %1787 = vmatprep.subr.bf16.mxu0 %v2271_v9  ;;  %1819 = vmatprep.subr.bf16.mxu1 %v2343_v33 }
 0x22c   :  { %693 = vmatprep.mubr.f32.mxu0 %v2231_v3  ;;  %764 = vmatprep.mubr.f32.mxu1 %v2231_v3 }
 0x22e   :  { %1789 = vmatpush1.bf16.msra.mxu0 %v2287_v14  ;;  %1821 = vmatpush1.bf16.msra.mxu1 %v2354_v37 }
 0x22f   :  { %1791 = vmatprep.subr.bf16.mxu0 %v2296_v17  ;;  %1823 = vmatprep.subr.bf16.mxu1 %v2378_v45 }
 0x232   :  { %1793 = vmatpush1.bf16.msra.mxu0 %v2321_v26  ;;  %1825 = vmatpush1.bf16.msra.mxu1 %v2387_v48 }
 0x233   :  { %1795 = vmatprep.subr.bf16.mxu0 %v2334_v30  ;;  %1827 = vmatprep.subr.bf16.mxu1 %v2399_v52 }
 0x236   :  { %1797 = vmatpush1.bf16.msra.mxu0 %v2370_v42  ;;  %1829 = vmatpush1.bf16.msra.mxu1 %v2429_v62 }
 0x237   :  { %1799 = vmatprep.subr.bf16.mxu0 %v2381_v46  ;;  %1831 = vmatprep.subr.bf16.mxu1 %v2435_v0 }
 0x23a   :  { %1801 = vmatpush1.bf16.msra.mxu0 %v2408_v55  ;;  %1833 = vmatpush1.bf16.msra.mxu1 %v2465_v15 }
 0x23b   :  { %1803 = vmatprep.subr.bf16.mxu0 %v2417_v58  ;;  %1835 = vmatprep.subr.bf16.mxu1 %v2471_v18 }
 0x23e   :  { %1805 = vmatpush1.bf16.msra.mxu0 %v2450_v7  ;;  %1837 = vmatpush1.bf16.msra.mxu1 %v2498_v31 }
 0x23f   :  { %1807 = vmatprep.subr.bf16.mxu0 %v2453_v10  ;;  %1839 = vmatprep.subr.bf16.mxu1 %v2501_v32 }
 0x242   :  { %1809 = vmatpush1.bf16.msra.mxu0 %v2486_v24  ;;  %1841 = vmatpush1.bf16.msra.mxu1 %v2520_v40 }
 0x243   :  { %1811 = vmatprep.subr.bf16.mxu0 %v2489_v27  ;;  %1843 = vmatprep.subr.bf16.mxu1 %v2523_v41 }
 0x246   :  { %1813 = vmatpush1.bf16.msra.mxu0 %v2516_v39  ;;  %1845 = vmatpush1.bf16.msra.mxu1 %v2533_v47 }
 0x247   :  { %1847 = vmatprep.subr.bf16.mxu0 %v2258_v4  ;;  %1879 = vmatprep.subr.bf16.mxu1 %v2310_v22 }
 0x2fc   :  { %v514_v49 = vpop.f32.mrb[4].mxu0  ;;  %v585_v50 = vpop.f32.mrb[4].mxu1 }
 0x2fd   :  { %v590_v51 = vadd.f32 %v1542_v35, %v514_v49  ;;  %v516_v53 = vpop.f32.mrb[5].mxu0  ;;  %v587_v54 = vpop.f32.mrb[5].mxu1  ;;  %v592_v2 = vadd.f32 %v1544_v63, %v585_v50  ;;  %v1551_v35 = vld [vmem:[%s2922_s0 + $0x68] sm:$0xff] }
 0x2fe   :  { %v591_v56 = vadd.f32 %v1543_v44, %v516_v53  ;;  %v593_v61 = vadd.f32 %v1545_v60, %v587_v54 }
 0x2ff   :  { %v1546_v57 = vmul.f32 -1.442695, %v590_v51 }
 0x300   :  { %v1547_v59 = vmul.f32 -1.442695, %v591_v56  ;;  %v1548_v1 = vmul.f32 -1.442695, %v593_v61  ;;  %v1552_v61 = vld [vmem:[%s2922_s0 + $0x70] sm:$0xff] }
 0x301   :  { %2135 = vpow2.f32 %v1546_v57 }
 0x302   :  { %2137 = vpow2.f32 %v1547_v59  ;;  %v1553_v59 = vld [vmem:[%s2922_s0 + $0x78] sm:$0xff] }
 0x303   :  { %2139 = vpow2.f32 %v1548_v1 }
 0x304   :  { %2141 = vtanh.f32 %v592_v2 }
 0x30b   :  { %v2136_v5 = vpop.eup %2135 }
 0x30c   :  { %v2138_v6 = vpop.eup %2137  ;;  %v597_v11 = vadd.f32 1.0, %v2136_v5 }
 0x30d   :  { %v603_v12 = vadd.f32 1.0, %v2138_v6  ;;  %v2140_v13 = vpop.eup %2139 }
 0x30e   :  { %2143 = vrcp.f32 %v597_v11  ;;  %v2142_v16 = vpop.eup %2141  ;;  %v610_v23 = vadd.f32 1.0, %v2140_v13 }
 0x30f   :  { %2145 = vrcp.f32 %v603_v12 }
 0x310   :  { %2147 = vrcp.f32 %v610_v23 }
 0x318   :  { %v2144_v19 = vpop.eup %2143 }
 0x319   :  { %v2146_v20 = vpop.eup %2145  ;;  %v614_v21 = vmul.f32 %v2144_v19, %v2142_v16 }
 0x31a   :  { %v613_v28 = vmul.f32 %v2146_v20, %v2640_v34  ;;  %v2148_v36 = vpop.eup %2147  ;;  %v1550_v34 = vld [vmem:[%s2922_s0 + $0x60] sm:$0xff] }
 0x31c   :  { %v2693_v29 = vadd.f32 %v614_v21, %v613_v28 }
 0x31e   :  { %2149 = vtanh.f32 %v2693_v29 }
 0x328   :  { %v2150_v38 = vpop.eup %2149 }
 0x329   :  { %v617_v43 = vmul.f32 %v2150_v38, %v2148_v36 }
 0x32b   :  { %1549 = vst [vmem:[%s2923_s2 + $0x10] sm:$0xff] %v617_v43  ;;  %694 = vmatmul.mubr.f32.vlgmr.msra.gmra.mrb[6].mxu0 %v617_v43  ;;  %765 = vmatmul.mubr.f32.vlgmr.msra.gmra.mrb[6].mxu1 %v617_v43 }
 0x32c   :  { %1849 = vmatpush1.bf16.msra.mxu0 %v2269_v8  ;;  %1881 = vmatpush1.bf16.msra.mxu1 %v2318_v25 }
 0x32d   :  { %1851 = vmatprep.subr.bf16.mxu0 %v2271_v9  ;;  %1883 = vmatprep.subr.bf16.mxu1 %v2343_v33 }
 0x32e   :  { %874 = vmatprep.mubr.f32.mxu0 %v2231_v3  ;;  %945 = vmatprep.mubr.f32.mxu1 %v2231_v3 }
 0x330   :  { %1853 = vmatpush1.bf16.msra.mxu0 %v2287_v14  ;;  %1885 = vmatpush1.bf16.msra.mxu1 %v2354_v37 }
 0x331   :  { %1855 = vmatprep.subr.bf16.mxu0 %v2296_v17  ;;  %1887 = vmatprep.subr.bf16.mxu1 %v2378_v45 }
 0x334   :  { %1857 = vmatpush1.bf16.msra.mxu0 %v2321_v26  ;;  %1889 = vmatpush1.bf16.msra.mxu1 %v2387_v48 }
 0x335   :  { %1859 = vmatprep.subr.bf16.mxu0 %v2334_v30  ;;  %1891 = vmatprep.subr.bf16.mxu1 %v2399_v52 }
 0x338   :  { %1861 = vmatpush1.bf16.msra.mxu0 %v2370_v42  ;;  %1893 = vmatpush1.bf16.msra.mxu1 %v2429_v62 }
 0x339   :  { %1863 = vmatprep.subr.bf16.mxu0 %v2381_v46  ;;  %1895 = vmatprep.subr.bf16.mxu1 %v2435_v0 }
 0x33c   :  { %1865 = vmatpush1.bf16.msra.mxu0 %v2408_v55  ;;  %1897 = vmatpush1.bf16.msra.mxu1 %v2465_v15 }
 0x33d   :  { %1867 = vmatprep.subr.bf16.mxu0 %v2417_v58  ;;  %1899 = vmatprep.subr.bf16.mxu1 %v2471_v18 }
 0x340   :  { %1869 = vmatpush1.bf16.msra.mxu0 %v2450_v7  ;;  %1901 = vmatpush1.bf16.msra.mxu1 %v2498_v31 }
 0x341   :  { %1871 = vmatprep.subr.bf16.mxu0 %v2453_v10  ;;  %1903 = vmatprep.subr.bf16.mxu1 %v2501_v32 }
 0x344   :  { %1873 = vmatpush1.bf16.msra.mxu0 %v2486_v24  ;;  %1905 = vmatpush1.bf16.msra.mxu1 %v2520_v40 }
 0x345   :  { %1875 = vmatprep.subr.bf16.mxu0 %v2489_v27  ;;  %1907 = vmatprep.subr.bf16.mxu1 %v2523_v41 }
 0x348   :  { %1877 = vmatpush1.bf16.msra.mxu0 %v2516_v39  ;;  %1909 = vmatpush1.bf16.msra.mxu1 %v2533_v47 }
 0x349   :  { %1911 = vmatprep.subr.bf16.mxu0 %v2258_v4  ;;  %1943 = vmatprep.subr.bf16.mxu1 %v2310_v22 }
 0x3fe   :  { %v695_v44 = vpop.f32.mrb[6].mxu0  ;;  %v766_v49 = vpop.f32.mrb[6].mxu1 }
 0x3ff   :  { %v771_v50 = vadd.f32 %v1550_v34, %v695_v44  ;;  %v697_v51 = vpop.f32.mrb[7].mxu0  ;;  %v768_v53 = vpop.f32.mrb[7].mxu1  ;;  %v773_v1 = vadd.f32 %v1552_v61, %v766_v49  ;;  %v1559_v34 = vld [vmem:[%s2922_s0 + $0x88] sm:$0xff] }
 0x400   :  { %v772_v54 = vadd.f32 %v1551_v35, %v697_v51  ;;  %v774_v60 = vadd.f32 %v1553_v59, %v768_v53 }
 0x401   :  { %v1554_v56 = vmul.f32 -1.442695, %v771_v50 }
 0x402   :  { %v1555_v57 = vmul.f32 -1.442695, %v772_v54  ;;  %v1556_v63 = vmul.f32 -1.442695, %v774_v60  ;;  %v1560_v60 = vld [vmem:[%s2922_s0 + $0x90] sm:$0xff] }
 0x403   :  { %2151 = vpow2.f32 %v1554_v56 }
 0x404   :  { %2153 = vpow2.f32 %v1555_v57  ;;  %v1561_v57 = vld [vmem:[%s2922_s0 + $0x98] sm:$0xff] }
 0x405   :  { %2155 = vpow2.f32 %v1556_v63 }
 0x406   :  { %2157 = vtanh.f32 %v773_v1 }
 0x40d   :  { %v2152_v2 = vpop.eup %2151 }
 0x40e   :  { %v2154_v5 = vpop.eup %2153  ;;  %v778_v6 = vadd.f32 1.0, %v2152_v2 }
 0x40f   :  { %v784_v11 = vadd.f32 1.0, %v2154_v5  ;;  %v2156_v12 = vpop.eup %2155 }
 0x410   :  { %2159 = vrcp.f32 %v778_v6  ;;  %v2158_v13 = vpop.eup %2157  ;;  %v791_v21 = vadd.f32 1.0, %v2156_v12 }
 0x411   :  { %2161 = vrcp.f32 %v784_v11 }
 0x412   :  { %2163 = vrcp.f32 %v791_v21 }
 0x41a   :  { %v2160_v16 = vpop.eup %2159 }
 0x41b   :  { %v2162_v19 = vpop.eup %2161  ;;  %v795_v20 = vmul.f32 %v2160_v16, %v2158_v13 }
 0x41c   :  { %v794_v23 = vmul.f32 %v2162_v19, %v2693_v29  ;;  %v2164_v36 = vpop.eup %2163  ;;  %v1558_v29 = vld [vmem:[%s2922_s0 + $0x80] sm:$0xff] }
 0x41e   :  { %v2746_v28 = vadd.f32 %v795_v20, %v794_v23 }
 0x420   :  { %2165 = vtanh.f32 %v2746_v28 }
 0x42a   :  { %v2166_v38 = vpop.eup %2165 }
 0x42b   :  { %v798_v43 = vmul.f32 %v2166_v38, %v2164_v36 }
 0x42d   :  { %1557 = vst [vmem:[%s2923_s2 + $0x18] sm:$0xff] %v798_v43  ;;  %875 = vmatmul.mubr.f32.vlgmr.msra.gmra.mrb[8].mxu0 %v798_v43  ;;  %946 = vmatmul.mubr.f32.vlgmr.msra.gmra.mrb[8].mxu1 %v798_v43 }
 0x42e   :  { %1913 = vmatpush1.bf16.msra.mxu0 %v2269_v8  ;;  %1945 = vmatpush1.bf16.msra.mxu1 %v2318_v25 }
 0x42f   :  { %1915 = vmatprep.subr.bf16.mxu0 %v2271_v9  ;;  %1947 = vmatprep.subr.bf16.mxu1 %v2343_v33 }
 0x430   :  { %1055 = vmatprep.mubr.f32.mxu0 %v2231_v3  ;;  %1126 = vmatprep.mubr.f32.mxu1 %v2231_v3 }
 0x432   :  { %1917 = vmatpush1.bf16.msra.mxu0 %v2287_v14  ;;  %1949 = vmatpush1.bf16.msra.mxu1 %v2354_v37 }
 0x433   :  { %1919 = vmatprep.subr.bf16.mxu0 %v2296_v17  ;;  %1951 = vmatprep.subr.bf16.mxu1 %v2378_v45 }
 0x436   :  { %1921 = vmatpush1.bf16.msra.mxu0 %v2321_v26  ;;  %1953 = vmatpush1.bf16.msra.mxu1 %v2387_v48 }
 0x437   :  { %1923 = vmatprep.subr.bf16.mxu0 %v2334_v30  ;;  %1955 = vmatprep.subr.bf16.mxu1 %v2399_v52 }
 0x43a   :  { %1925 = vmatpush1.bf16.msra.mxu0 %v2370_v42  ;;  %1957 = vmatpush1.bf16.msra.mxu1 %v2429_v62 }
 0x43b   :  { %1927 = vmatprep.subr.bf16.mxu0 %v2381_v46  ;;  %1959 = vmatprep.subr.bf16.mxu1 %v2435_v0 }
 0x43e   :  { %1929 = vmatpush1.bf16.msra.mxu0 %v2408_v55  ;;  %1961 = vmatpush1.bf16.msra.mxu1 %v2465_v15 }
 0x43f   :  { %1931 = vmatprep.subr.bf16.mxu0 %v2417_v58  ;;  %1963 = vmatprep.subr.bf16.mxu1 %v2471_v18 }
 0x442   :  { %1933 = vmatpush1.bf16.msra.mxu0 %v2450_v7  ;;  %1965 = vmatpush1.bf16.msra.mxu1 %v2498_v31 }
 0x443   :  { %1935 = vmatprep.subr.bf16.mxu0 %v2453_v10  ;;  %1967 = vmatprep.subr.bf16.mxu1 %v2501_v32 }
 0x446   :  { %1937 = vmatpush1.bf16.msra.mxu0 %v2486_v24  ;;  %1969 = vmatpush1.bf16.msra.mxu1 %v2520_v40 }
 0x447   :  { %1939 = vmatprep.subr.bf16.mxu0 %v2489_v27  ;;  %1971 = vmatprep.subr.bf16.mxu1 %v2523_v41 }
 0x44a   :  { %1941 = vmatpush1.bf16.msra.mxu0 %v2516_v39  ;;  %1973 = vmatpush1.bf16.msra.mxu1 %v2533_v47 }
 0x44b   :  { %1975 = vmatprep.subr.bf16.mxu0 %v2258_v4  ;;  %2007 = vmatprep.subr.bf16.mxu1 %v2310_v22 }
 0x500   :  { %v876_v35 = vpop.f32.mrb[8].mxu0  ;;  %v947_v44 = vpop.f32.mrb[8].mxu1 }
 0x501   :  { %v952_v49 = vadd.f32 %v1558_v29, %v876_v35  ;;  %v878_v50 = vpop.f32.mrb[9].mxu0  ;;  %v949_v51 = vpop.f32.mrb[9].mxu1  ;;  %v954_v63 = vadd.f32 %v1560_v60, %v947_v44  ;;  %v1567_v29 = vld [vmem:[%s2922_s0 + $0xa8] sm:$0xff] }
 0x502   :  { %v953_v53 = vadd.f32 %v1559_v34, %v878_v50  ;;  %v955_v59 = vadd.f32 %v1561_v57, %v949_v51 }
 0x503   :  { %v1562_v54 = vmul.f32 -1.442695, %v952_v49 }
 0x504   :  { %v1563_v56 = vmul.f32 -1.442695, %v953_v53  ;;  %v1564_v61 = vmul.f32 -1.442695, %v955_v59 }
 0x505   :  { %2167 = vpow2.f32 %v1562_v54 }
 0x506   :  { %2169 = vpow2.f32 %v1563_v56  ;;  %v1568_v56 = vld [vmem:[%s2922_s0 + $0xb0] sm:$0xff] }
 0x507   :  { %2171 = vpow2.f32 %v1564_v61 }
 0x508   :  { %2173 = vtanh.f32 %v954_v63 }
 0x50f   :  { %v2168_v1 = vpop.eup %2167 }
 0x510   :  { %v2170_v2 = vpop.eup %2169  ;;  %v959_v5 = vadd.f32 1.0, %v2168_v1 }
 0x511   :  { %v965_v6 = vadd.f32 1.0, %v2170_v2  ;;  %v2172_v11 = vpop.eup %2171 }
 0x512   :  { %2175 = vrcp.f32 %v959_v5  ;;  %v2174_v12 = vpop.eup %2173  ;;  %v972_v20 = vadd.f32 1.0, %v2172_v11 }
 0x513   :  { %2177 = vrcp.f32 %v965_v6 }
 0x514   :  { %2179 = vrcp.f32 %v972_v20 }
 0x51c   :  { %v2176_v13 = vpop.eup %2175 }
 0x51d   :  { %v2178_v16 = vpop.eup %2177  ;;  %v976_v19 = vmul.f32 %v2176_v13, %v2174_v12 }
 0x51e   :  { %v975_v21 = vmul.f32 %v2178_v16, %v2746_v28  ;;  %v2180_v36 = vpop.eup %2179  ;;  %v1566_v28 = vld [vmem:[%s2922_s0 + $0xa0] sm:$0xff] }
 0x520   :  { %v2799_v23 = vadd.f32 %v976_v19, %v975_v21 }
 0x522   :  { %2181 = vtanh.f32 %v2799_v23 }
 0x52c   :  { %v2182_v38 = vpop.eup %2181 }
 0x52d   :  { %v979_v43 = vmul.f32 %v2182_v38, %v2180_v36 }
 0x52f   :  { %1565 = vst [vmem:[%s2923_s2 + $0x20] sm:$0xff] %v979_v43  ;;  %1056 = vmatmul.mubr.f32.vlgmr.msra.gmra.mrb[10].mxu0 %v979_v43  ;;  %1127 = vmatmul.mubr.f32.vlgmr.msra.gmra.mrb[10].mxu1 %v979_v43 }
 0x530   :  { %1977 = vmatpush1.bf16.msra.mxu0 %v2269_v8  ;;  %2009 = vmatpush1.bf16.msra.mxu1 %v2318_v25 }
 0x531   :  { %1979 = vmatprep.subr.bf16.mxu0 %v2271_v9  ;;  %2011 = vmatprep.subr.bf16.mxu1 %v2343_v33 }
 0x532   :  { %1236 = vmatprep.mubr.f32.mxu0 %v2231_v3  ;;  %1307 = vmatprep.mubr.f32.mxu1 %v2231_v3 }
 0x534   :  { %1981 = vmatpush1.bf16.msra.mxu0 %v2287_v14  ;;  %2013 = vmatpush1.bf16.msra.mxu1 %v2354_v37 }
 0x535   :  { %1983 = vmatprep.subr.bf16.mxu0 %v2296_v17  ;;  %2015 = vmatprep.subr.bf16.mxu1 %v2378_v45 }
 0x538   :  { %1985 = vmatpush1.bf16.msra.mxu0 %v2321_v26  ;;  %2017 = vmatpush1.bf16.msra.mxu1 %v2387_v48 }
 0x539   :  { %1987 = vmatprep.subr.bf16.mxu0 %v2334_v30  ;;  %2019 = vmatprep.subr.bf16.mxu1 %v2399_v52 }
 0x53c   :  { %1989 = vmatpush1.bf16.msra.mxu0 %v2370_v42  ;;  %2021 = vmatpush1.bf16.msra.mxu1 %v2429_v62 }
 0x53d   :  { %1991 = vmatprep.subr.bf16.mxu0 %v2381_v46  ;;  %2023 = vmatprep.subr.bf16.mxu1 %v2435_v0 }
 0x540   :  { %1993 = vmatpush1.bf16.msra.mxu0 %v2408_v55  ;;  %2025 = vmatpush1.bf16.msra.mxu1 %v2465_v15 }
 0x541   :  { %1995 = vmatprep.subr.bf16.mxu0 %v2417_v58  ;;  %2027 = vmatprep.subr.bf16.mxu1 %v2471_v18 }
 0x544   :  { %1997 = vmatpush1.bf16.msra.mxu0 %v2450_v7  ;;  %2029 = vmatpush1.bf16.msra.mxu1 %v2498_v31 }
 0x545   :  { %1999 = vmatprep.subr.bf16.mxu0 %v2453_v10  ;;  %2031 = vmatprep.subr.bf16.mxu1 %v2501_v32 }
 0x548   :  { %2001 = vmatpush1.bf16.msra.mxu0 %v2486_v24  ;;  %2033 = vmatpush1.bf16.msra.mxu1 %v2520_v40 }
 0x549   :  { %2003 = vmatprep.subr.bf16.mxu0 %v2489_v27  ;;  %2035 = vmatprep.subr.bf16.mxu1 %v2523_v41 }
 0x54c   :  { %2005 = vmatpush1.bf16.msra.mxu0 %v2516_v39  ;;  %2037 = vmatpush1.bf16.msra.mxu1 %v2533_v47 }
 0x54d   :  { %2039 = vmatprep.subr.bf16.mxu0 %v2258_v4  ;;  %2071 = vmatprep.subr.bf16.mxu1 %v2310_v22  ;;  %v1569_v4 = vld [vmem:[%s2922_s0 + $0xb8] sm:$0xff] }
 0x602   :  { %v1057_v34 = vpop.f32.mrb[10].mxu0  ;;  %v1128_v35 = vpop.f32.mrb[10].mxu1 }
 0x603   :  { %v1133_v44 = vadd.f32 %v1566_v28, %v1057_v34  ;;  %v1059_v49 = vpop.f32.mrb[11].mxu0  ;;  %v1130_v50 = vpop.f32.mrb[11].mxu1  ;;  %v1135_v59 = vadd.f32 %v1568_v56, %v1128_v35 }
 0x604   :  { %v1134_v51 = vadd.f32 %v1567_v29, %v1059_v49  ;;  %v1136_v22 = vadd.f32 %v1569_v4, %v1130_v50  ;;  %v1585_v50 = vld [vmem:[%s2922_s0 + $0xf8] sm:$0xff] }
 0x605   :  { %v1570_v53 = vmul.f32 -1.442695, %v1133_v44 }
 0x606   :  { %v1571_v54 = vmul.f32 -1.442695, %v1134_v51  ;;  %v1572_v57 = vmul.f32 -1.442695, %v1136_v22 }
 0x607   :  { %2183 = vpow2.f32 %v1570_v53  ;;  %v1584_v53 = vld [vmem:[%s2922_s0 + $0xf0] sm:$0xff] }
 0x608   :  { %2185 = vpow2.f32 %v1571_v54 }
 0x609   :  { %2187 = vpow2.f32 %v1572_v57 }
 0x60a   :  { %2189 = vtanh.f32 %v1135_v59 }
 0x611   :  { %v2184_v60 = vpop.eup %2183 }
 0x612   :  { %v2186_v61 = vpop.eup %2185  ;;  %v1140_v63 = vadd.f32 1.0, %v2184_v60 }
 0x613   :  { %v1146_v1 = vadd.f32 1.0, %v2186_v61  ;;  %v2188_v2 = vpop.eup %2187 }
 0x614   :  { %2191 = vrcp.f32 %v1140_v63  ;;  %v2190_v5 = vpop.eup %2189  ;;  %v1153_v13 = vadd.f32 1.0, %v2188_v2 }
 0x615   :  { %2193 = vrcp.f32 %v1146_v1 }
 0x616   :  { %2195 = vrcp.f32 %v1153_v13 }
 0x61e   :  { %v2192_v6 = vpop.eup %2191 }
 0x61f   :  { %v2194_v11 = vpop.eup %2193  ;;  %v1157_v12 = vmul.f32 %v2192_v6, %v2190_v5 }
 0x620   :  { %v1156_v16 = vmul.f32 %v2194_v11, %v2799_v23  ;;  %v2196_v20 = vpop.eup %2195  ;;  %v1583_v23 = vld [vmem:[%s2922_s0 + $0xe8] sm:$0xff] }
 0x622   :  { %v2852_v19 = vadd.f32 %v1157_v12, %v1156_v16 }
 0x624   :  { %2197 = vtanh.f32 %v2852_v19 }
 0x62e   :  { %v2198_v21 = vpop.eup %2197 }
 0x62f   :  { %v1160_v36 = vmul.f32 %v2198_v21, %v2196_v20 }
 0x631   :  { %1573 = vst [vmem:[%s2923_s2 + $0x28] sm:$0xff] %v1160_v36  ;;  %1237 = vmatmul.mubr.f32.vlgmr.msra.gmra.mrb[12].mxu0 %v1160_v36  ;;  %1308 = vmatmul.mubr.f32.vlgmr.msra.gmra.mrb[12].mxu1 %v1160_v36 }
 0x632   :  { %2041 = vmatpush1.bf16.msra.mxu0 %v2269_v8  ;;  %2073 = vmatpush1.bf16.msra.mxu1 %v2318_v25  ;;  %v1575_v8 = vld [vmem:[%s2922_s0 + $0xc8] sm:$0xff] }
 0x633   :  { %2043 = vmatprep.subr.bf16.mxu0 %v2271_v9  ;;  %2075 = vmatprep.subr.bf16.mxu1 %v2343_v33 }
 0x634   :  { %1417 = vmatprep.mubr.f32.mxu0 %v2231_v3  ;;  %1488 = vmatprep.mubr.f32.mxu1 %v2231_v3  ;;  %v1574_v3 = vld [vmem:[%s2922_s0 + $0xc0] sm:$0xff] }
 0x636   :  { %2045 = vmatpush1.bf16.msra.mxu0 %v2287_v14  ;;  %2077 = vmatpush1.bf16.msra.mxu1 %v2354_v37 }
 0x637   :  { %2047 = vmatprep.subr.bf16.mxu0 %v2296_v17  ;;  %2079 = vmatprep.subr.bf16.mxu1 %v2378_v45 }
 0x63a   :  { %2049 = vmatpush1.bf16.msra.mxu0 %v2321_v26  ;;  %2081 = vmatpush1.bf16.msra.mxu1 %v2387_v48 }
 0x63b   :  { %2051 = vmatprep.subr.bf16.mxu0 %v2334_v30  ;;  %2083 = vmatprep.subr.bf16.mxu1 %v2399_v52 }
 0x63e   :  { %2053 = vmatpush1.bf16.msra.mxu0 %v2370_v42  ;;  %2085 = vmatpush1.bf16.msra.mxu1 %v2429_v62  ;;  %v1577_v42 = vld [vmem:[%s2922_s0 + $0xd8] sm:$0xff] }
 0x63f   :  { %2055 = vmatprep.subr.bf16.mxu0 %v2381_v46  ;;  %2087 = vmatprep.subr.bf16.mxu1 %v2435_v0  ;;  %v1576_v46 = vld [vmem:[%s2922_s0 + $0xd0] sm:$0xff] }
 0x642   :  { %2057 = vmatpush1.bf16.msra.mxu0 %v2408_v55  ;;  %2089 = vmatpush1.bf16.msra.mxu1 %v2465_v15 }
 0x643   :  { %2059 = vmatprep.subr.bf16.mxu0 %v2417_v58  ;;  %2091 = vmatprep.subr.bf16.mxu1 %v2471_v18 }
 0x646   :  { %2061 = vmatpush1.bf16.msra.mxu0 %v2450_v7  ;;  %2093 = vmatpush1.bf16.msra.mxu1 %v2498_v31 }
 0x647   :  { %2063 = vmatprep.subr.bf16.mxu0 %v2453_v10  ;;  %2095 = vmatprep.subr.bf16.mxu1 %v2501_v32 }
 0x64a   :  { %2065 = vmatpush1.bf16.msra.mxu0 %v2486_v24  ;;  %2097 = vmatpush1.bf16.msra.mxu1 %v2520_v40 }
 0x64b   :  { %2067 = vmatprep.subr.bf16.mxu0 %v2489_v27  ;;  %2099 = vmatprep.subr.bf16.mxu1 %v2523_v41 }
 0x64e   :  { %2069 = vmatpush1.bf16.msra.mxu0 %v2516_v39  ;;  %2101 = vmatpush1.bf16.msra.mxu1 %v2533_v47  ;;  %v1582_v47 = vld [vmem:[%s2922_s0 + $0xe0] sm:$0xff] }
 0x704   :  { %v1238_v9 = vpop.f32.mrb[12].mxu0  ;;  %v1309_v14 = vpop.f32.mrb[12].mxu1 }
 0x705   :  { %v1314_v17 = vadd.f32 %v1574_v3, %v1238_v9  ;;  %v1240_v25 = vpop.f32.mrb[13].mxu0  ;;  %v1311_v26 = vpop.f32.mrb[13].mxu1  ;;  %v1316_v52 = vadd.f32 %v1576_v46, %v1309_v14 }
 0x706   :  { %v1315_v30 = vadd.f32 %v1575_v8, %v1240_v25  ;;  %v1317_v45 = vadd.f32 %v1577_v42, %v1311_v26 }
 0x707   :  { %v1578_v33 = vmul.f32 -1.442695, %v1314_v17 }
 0x708   :  { %v1579_v37 = vmul.f32 -1.442695, %v1315_v30  ;;  %v1580_v48 = vmul.f32 -1.442695, %v1317_v45 }
 0x709   :  { %2199 = vpow2.f32 %v1578_v33 }
 0x70a   :  { %2201 = vpow2.f32 %v1579_v37 }
 0x70b   :  { %2203 = vpow2.f32 %v1580_v48 }
 0x70c   :  { %2205 = vtanh.f32 %v1316_v52 }
 0x713   :  { %v2200_v55 = vpop.eup %2199 }
 0x714   :  { %v2202_v58 = vpop.eup %2201  ;;  %v1321_v62 = vadd.f32 1.0, %v2200_v55 }
 0x715   :  { %v1327_v0 = vadd.f32 1.0, %v2202_v58  ;;  %v2204_v7 = vpop.eup %2203 }
 0x716   :  { %2207 = vrcp.f32 %v1321_v62  ;;  %v2206_v10 = vpop.eup %2205  ;;  %v1334_v27 = vadd.f32 1.0, %v2204_v7 }
 0x717   :  { %2209 = vrcp.f32 %v1327_v0 }
 0x718   :  { %2211 = vrcp.f32 %v1334_v27 }
 0x720   :  { %v2208_v15 = vpop.eup %2207 }
 0x721   :  { %v2210_v18 = vpop.eup %2209  ;;  %v1338_v24 = vmul.f32 %v2208_v15, %v2206_v10 }
 0x722   :  { %v1337_v31 = vmul.f32 %v2210_v18, %v2852_v19  ;;  %v2212_v39 = vpop.eup %2211 }
 0x724   :  { %v1339_v32 = vadd.f32 %v1338_v24, %v1337_v31 }
 0x726   :  { %2213 = vtanh.f32 %v1339_v32 }
 0x730   :  { %v2214_v40 = vpop.eup %2213 }
 0x731   :  { %v1341_v41 = vmul.f32 %v2214_v40, %v2212_v39 }
 0x733   :  { %1581 = vst [vmem:[%s2923_s2 + $0x30] sm:$0xff] %v1341_v41  ;;  %1418 = vmatmul.mubr.f32.vlgmr.msra.gmra.mrb[14].mxu0 %v1341_v41  ;;  %1489 = vmatmul.mubr.f32.vlgmr.msra.gmra.mrb[14].mxu1 %v1341_v41 }
 0x806   :  { %v1419_v38 = vpop.f32.mrb[14].mxu0  ;;  %v1490_v43 = vpop.f32.mrb[14].mxu1 }
 0x807   :  { %v1495_v28 = vadd.f32 %v1582_v47, %v1419_v38  ;;  %v1421_v29 = vpop.f32.mrb[15].mxu0  ;;  %v1492_v34 = vpop.f32.mrb[15].mxu1  ;;  %v1497_v4 = vadd.f32 %v1584_v53, %v1490_v43 }
 0x808   :  { %v1496_v35 = vadd.f32 %v1583_v23, %v1421_v29  ;;  %v1498_v51 = vadd.f32 %v1585_v50, %v1492_v34 }
 0x809   :  { %v1586_v44 = vmul.f32 -1.442695, %v1495_v28 }
 0x80a   :  { %v1587_v49 = vmul.f32 -1.442695, %v1496_v35  ;;  %v1588_v54 = vmul.f32 -1.442695, %v1498_v51 }
 0x80b   :  { %2215 = vpow2.f32 %v1586_v44 }
 0x80c   :  { %2217 = vpow2.f32 %v1587_v49 }
 0x80d   :  { %2219 = vpow2.f32 %v1588_v54 }
 0x80e   :  { %2221 = vtanh.f32 %v1497_v4 }
 0x815   :  { %v2216_v22 = vpop.eup %2215 }
 0x816   :  { %v2218_v56 = vpop.eup %2217  ;;  %v1502_v57 = vadd.f32 1.0, %v2216_v22 }
 0x817   :  { %v1508_v59 = vadd.f32 1.0, %v2218_v56  ;;  %v2220_v60 = vpop.eup %2219 }
 0x818   :  { %2223 = vrcp.f32 %v1502_v57  ;;  %v2222_v61 = vpop.eup %2221  ;;  %v1515_v5 = vadd.f32 1.0, %v2220_v60 }
 0x819   :  { %2225 = vrcp.f32 %v1508_v59 }
 0x81a   :  { %2227 = vrcp.f32 %v1515_v5 }
 0x822   :  { %v2224_v63 = vpop.eup %2223 }
 0x823   :  { %v2226_v1 = vpop.eup %2225  ;;  %v1519_v2 = vmul.f32 %v2224_v63, %v2222_v61 }
 0x824   :  { %v1518_v6 = vmul.f32 %v2226_v1, %v1339_v32  ;;  %v2228_v12 = vpop.eup %2227 }
 0x826   :  { %v1520_v11 = vadd.f32 %v1519_v2, %v1518_v6 }
 0x828   :  { %2229 = vtanh.f32 %v1520_v11 }
 0x832   :  { %v2230_v13 = vpop.eup %2229 }
 0x833   :  { %v1522_v16 = vmul.f32 %v2230_v13, %v2228_v12 }
 0x835   :  { %1589 = vst [vmem:[%s2923_s2 + $0x38] sm:$0xff] %v1522_v16 }

</bundles_post_ra>
